<compile_context>
chip_gen: v7x
topology: tpu7x:2x2x1
jax: 0.10.0
libtpu: 0.0.40
codegen_flags: <defaults>
</compile_context>

<pallas_src>
import numpy as np

import jax
import jax.numpy as jnp
from jax.experimental import pallas as pl
from jax.experimental.pallas import tpu as pltpu

# ----------------------------- configuration --------------------------------

MXU_DTYPE = jnp.bfloat16      # matmul operand dtype (f32 accumulation / f32 epilogue)
FEATURE_DTYPE = jnp.bfloat16  # feature write-back dtype (halves HBM writes; flip to
                              # jnp.float32 if a downstream head needs full precision)

_KSIZE = 3
_STEM_STRIDE, _STEM_PAD = 2, 1
_BLOCK_STRIDE_PAD = ((1, 1), (2, 1))   # (stride, pad) of blocks[0], blocks[1]


def _conv_out_hw(h, w, stride, pad, k=_KSIZE):
    return (h + 2 * pad - k) // stride + 1, (w + 2 * pad - k) // stride + 1


def _gather_mats(ih, iw, stride, pad, k=_KSIZE):
    """Constant (k*k, IH*IW, OH*OW) 0/1 tap-gather matrices.

    G[t, m_in, m_out] = 1  iff output position m_out reads input position m_in for
    kernel tap t = di*k+dj (rows of out-of-bounds taps stay all-zero == zero padding).
    """
    oh, ow = _conv_out_hw(ih, iw, stride, pad, k)
    g = np.zeros((k * k, ih * iw, oh * ow), np.float32)
    for di in range(k):
        for dj in range(k):
            t = di * k + dj
            for r in range(oh):
                src_r = stride * r + di - pad
                if not 0 <= src_r < ih:
                    continue
                for c in range(ow):
                    src_c = stride * c + dj - pad
                    if not 0 <= src_c < iw:
                        continue
                    g[t, src_r * iw + src_c, r * ow + c] = 1.0
    return g


# ----------------------------- Pallas kernel ---------------------------------

def _silu(z):
    # SiLU = z * sigmoid(z); exp and the approximate reciprocal both map to the EUP
    # slot, which is idle in this kernel -> effectively free.
    return z * pl.reciprocal(1.0 + jnp.exp(-z), approx=True)


def _conv3x3(a_bf16, g_ref, w_ref):
    """3x3 conv in channels-first layout via 9 tap matmuls.

    a_bf16 : (Cin, M_in)   activation, bf16
    g_ref  : (9, M_in, M_out) constant 0/1 gather matrices (bf16)
    w_ref  : (9, Cout, Cin)   per-tap transposed weights (bf16, BN scale may be folded)
    returns: (Cout, M_out) f32
    The gather matmul (A @ G_t) is exact: each output column copies one bf16 value.
    """
    cout = w_ref.shape[1]
    mout = g_ref.shape[2]
    acc = jnp.zeros((cout, mout), jnp.float32)
    for t in range(g_ref.shape[0]):                       # unrolled: 9 taps
        taps = jnp.dot(a_bf16, g_ref[t], preferred_element_type=jnp.float32)
        acc = acc + jnp.dot(w_ref[t], taps.astype(MXU_DTYPE),
                            preferred_element_type=jnp.float32)
    return acc


def _encoder_kernel(x_ref, g1_ref, g2_ref, g3_ref,
                    w1_ref, s1_ref, b1_ref,
                    w2_ref, b2_ref, w3_ref, b3_ref,
                    conv_ref, bn_ref, act_ref, blk0_ref, blk1_ref):
    """Whole backbone for one image; every intermediate stays in VMEM/vregs and each
    exposed feature is written to HBM exactly once (bf16, true channel width)."""
    a0 = x_ref[0].astype(MXU_DTYPE)                       # (Cin, H*W)

    # ---- conv_stem -> bn1 -> act1 (three exposed features) ----
    y = _conv3x3(a0, g1_ref, w1_ref)                      # (16, OH1*OW1) f32
    conv_ref[0] = y.astype(conv_ref.dtype)
    z = y * s1_ref[...] + b1_ref[...]                     # BN affine (VPU)
    bn_ref[0] = z.astype(bn_ref.dtype)
    a1 = _silu(z)
    act_ref[0] = a1.astype(act_ref.dtype)

    # ---- blocks[0]: Conv(16->24,s1,p1) + BN(folded) + SiLU ----
    a2 = _silu(_conv3x3(a1.astype(MXU_DTYPE), g2_ref, w2_ref) + b2_ref[...])
    blk0_ref[0] = a2.astype(blk0_ref.dtype)

    # ---- blocks[1]: Conv(24->32,s2,p1) + BN(folded) + SiLU ----
    a3 = _silu(_conv3x3(a2.astype(MXU_DTYPE), g3_ref, w3_ref) + b3_ref[...])
    blk1_ref[0] = a3.astype(blk1_ref.dtype)


# ----------------------------- JAX glue --------------------------------------

def _fold_bn(bn, eps=1e-5):
    scale = bn["gamma"] / jnp.sqrt(bn["var"] + eps)
    bias = bn["beta"] - bn["mean"] * scale
    return scale, bias


def _prep_conv(w_hwio, scale=None):
    """HWIO weights -> (9, Cout, Cin) per-tap transposed weights (bf16); optionally
    fold the BN scale into the output-channel rows."""
    kh, kw, cin, cout = w_hwio.shape
    wt = jnp.transpose(w_hwio.reshape(kh * kw, cin, cout), (0, 2, 1))   # (9, Cout, Cin)
    if scale is not None:
        wt = wt * scale[None, :, None]
    return wt.astype(MXU_DTYPE)


@jax.jit
def encoder_forward(x_nchw, params):
    """Mirrors Encoder.forward: [x, conv_stem(x), bn1(.), act1(.), block0(.), block1(.)],
    all NCHW.  One fused pallas_call; boundary reshapes are metadata-only."""
    N, cin, H, W = x_nchw.shape
    c1 = params["conv_stem"].shape[-1]
    c2 = params["blocks"][0]["w"].shape[-1]
    c3 = params["blocks"][1]["w"].shape[-1]

    oh1, ow1 = _conv_out_hw(H, W, _STEM_STRIDE, _STEM_PAD)
    (st2, pd2), (st3, pd3) = _BLOCK_STRIDE_PAD
    oh2, ow2 = _conv_out_hw(oh1, ow1, st2, pd2)
    oh3, ow3 = _conv_out_hw(oh2, ow2, st3, pd3)
    m0, m1, m2, m3 = H * W, oh1 * ow1, oh2 * ow2, oh3 * ow3

    # constant tap-gather matrices (trace-time constants; bf16 halves their HBM read)
    g1 = jnp.asarray(_gather_mats(H, W, _STEM_STRIDE, _STEM_PAD), MXU_DTYPE)
    g2 = jnp.asarray(_gather_mats(oh1, ow1, st2, pd2), MXU_DTYPE)
    g3 = jnp.asarray(_gather_mats(oh2, ow2, st3, pd3), MXU_DTYPE)

    # parameters (stem keeps BN as an epilogue so the raw conv output can be exposed;
    # blocks fold the BN scale into the weights)
    w1 = _prep_conv(params["conv_stem"])
    sc1, bi1 = _fold_bn(params["bn1"])
    s1, b1 = sc1.reshape(c1, 1), bi1.reshape(c1, 1)
    sc2, bi2 = _fold_bn(params["blocks"][0]["bn"])
    w2, b2 = _prep_conv(params["blocks"][0]["w"], sc2), bi2.reshape(c2, 1)
    sc3, bi3 = _fold_bn(params["blocks"][1]["bn"])
    w3, b3 = _prep_conv(params["blocks"][1]["w"], sc3), bi3.reshape(c3, 1)

    x_flat = x_nchw.reshape(N, cin, m0)      # free: NCHW is already channels-major

    img = lambda c, m: pl.BlockSpec((1, c, m), lambda n: (n, 0, 0))
    full = lambda shape: pl.BlockSpec(tuple(shape), lambda n: (0,) * len(shape))

    out_shape = [
        jax.ShapeDtypeStruct((N, c1, m1), FEATURE_DTYPE),   # conv_stem
        jax.ShapeDtypeStruct((N, c1, m1), FEATURE_DTYPE),   # bn1
        jax.ShapeDtypeStruct((N, c1, m1), FEATURE_DTYPE),   # act1
        jax.ShapeDtypeStruct((N, c2, m2), FEATURE_DTYPE),   # blocks[0]
        jax.ShapeDtypeStruct((N, c3, m3), FEATURE_DTYPE),   # blocks[1]
    ]
    out_specs = [img(c1, m1), img(c1, m1), img(c1, m1), img(c2, m2), img(c3, m3)]

    feat_bytes = jnp.dtype(FEATURE_DTYPE).itemsize
    flops = 2 * N * 9 * (cin * m0 * m1 + c1 * cin * m1
                         + c1 * m1 * m2 + c2 * c1 * m2
                         + c2 * m2 * m3 + c3 * c2 * m3)
    trans = 2 * N * (c1 * m1 + c2 * m2 + c3 * m3)
    bytes_acc = (x_flat.size * 4
                 + (g1.size + g2.size + g3.size + w1.size + w2.size + w3.size) * 2
                 + (s1.size + b1.size + b2.size + b3.size) * 4
                 + N * (3 * c1 * m1 + c2 * m2 + c3 * m3) * feat_bytes)

    conv_o, bn_o, act_o, blk0_o, blk1_o = pl.pallas_call(
        _encoder_kernel,
        grid=(N,),
        in_specs=[img(cin, m0),
                  full(g1.shape), full(g2.shape), full(g3.shape),
                  full(w1.shape), full(s1.shape), full(b1.shape),
                  full(w2.shape), full(b2.shape),
                  full(w3.shape), full(b3.shape)],
        out_specs=out_specs,
        out_shape=out_shape,
        compiler_params=pltpu.CompilerParams(
            dimension_semantics=("parallel",),   # batch images are independent (v7x 2 TCs)
        ),
        cost_estimate=pl.CostEstimate(flops=int(flops), transcendentals=int(trans),
                                      bytes_accessed=int(bytes_acc)),
    )(x_flat, g1, g2, g3, w1, s1, b1, w2, b2, w3, b3)

    # NC(HW) -> NCHW is a pure metadata reshape: no extra per-feature HBM pass.
    features = [x_nchw,
                conv_o.reshape(N, c1, oh1, ow1),
                bn_o.reshape(N, c1, oh1, ow1),
                act_o.reshape(N, c1, oh1, ow1),
                blk0_o.reshape(N, c2, oh2, ow2),
                blk1_o.reshape(N, c3, oh3, ow3)]
    return features


# ----------------------------- deterministic params ---------------------------

def make_params(key):
    ks = jax.random.split(key, 8)

    def conv_w(k, kh, kw, cin, cout):
        fan_in = kh * kw * cin
        return jax.random.normal(k, (kh, kw, cin, cout), jnp.float32) / jnp.sqrt(float(fan_in))

    def bn_p(k, c):
        k1, k2, k3, k4 = jax.random.split(k, 4)
        return dict(
            gamma=1.0 + 0.1 * jax.random.normal(k1, (c,), jnp.float32),
            beta=0.1 * jax.random.normal(k2, (c,), jnp.float32),
            mean=0.1 * jax.random.normal(k3, (c,), jnp.float32),
            var=0.5 + jnp.abs(jax.random.normal(k4, (c,), jnp.float32)),
        )

    return dict(
        conv_stem=conv_w(ks[0], 3, 3, 3, 16),
        bn1=bn_p(ks[1], 16),
        blocks=[
            dict(w=conv_w(ks[2], 3, 3, 16, 24), bn=bn_p(ks[3], 24)),
            dict(w=conv_w(ks[4], 3, 3, 24, 32), bn=bn_p(ks[5], 32)),
        ],
    )


# ----------------------------- pure-JAX f32 reference --------------------------

def _ref_conv(x, w_hwio, stride, pad):
    w_oihw = jnp.transpose(w_hwio, (3, 2, 0, 1))
    return jax.lax.conv_general_dilated(
        x, w_oihw, (stride, stride), ((pad, pad), (pad, pad)),
        dimension_numbers=("NCHW", "OIHW", "NCHW"))


def _ref_bn(x, bn, eps=1e-5):
    s = (bn["gamma"] / jnp.sqrt(bn["var"] + eps)).reshape(1, -1, 1, 1)
    b = (bn["beta"] - bn["mean"] * bn["gamma"] / jnp.sqrt(bn["var"] + eps)).reshape(1, -1, 1, 1)
    return x * s + b


def _ref_silu(x):
    return x * jax.nn.sigmoid(x)


def encoder_forward_ref(x, params):
    feats = [x]
    feats.append(_ref_conv(feats[-1], params["conv_stem"], _STEM_STRIDE, _STEM_PAD))
    feats.append(_ref_bn(feats[-1], params["bn1"]))
    feats.append(_ref_silu(feats[-1]))
    for blk, (stride, pad) in zip(params["blocks"], _BLOCK_STRIDE_PAD):
        feats.append(_ref_silu(_ref_bn(_ref_conv(feats[-1], blk["w"], stride, pad), blk["bn"])))
    return feats


# ----------------------------- main --------------------------------------------

if __name__ == "__main__":
    key = jax.random.PRNGKey(0)
    kx, kp = jax.random.split(key)
    x = jax.random.normal(kx, (2, 3, 16, 16), jnp.float32)   # NCHW (PyTorch convention)
    params = make_params(kp)

    feats = encoder_forward(x, params)
    feats = [jax.block_until_ready(f) for f in feats]

    refs = encoder_forward_ref(x, params)
    assert len(feats) == len(refs) == 6
    # bf16 MXU operands + bf16 feature write-back vs pure-f32 reference -> relaxed tol.
    for f, r in zip(feats, refs):
        assert f.shape == r.shape, (f.shape, r.shape)
        f32 = f.astype(jnp.float32)
        err = float(jnp.max(jnp.abs(f32 - r)))
        assert jnp.allclose(f32, r, atol=5e-2, rtol=5e-2), err

    print("KERNEL_OK")
</pallas_src>

<mosaic_0001>
module attributes {stable_mosaic.version = 11 : i64} {
  func.func @_encoder_kernel(%arg0: i32, %arg1: memref<1x3x256xf32, #tpu.memory_space<vmem>>, %arg2: memref<9x256x64xbf16, #tpu.memory_space<vmem>>, %arg3: memref<9x64x64xbf16, #tpu.memory_space<vmem>>, %arg4: memref<9x64x16xbf16, #tpu.memory_space<vmem>>, %arg5: memref<9x16x3xbf16, #tpu.memory_space<vmem>>, %arg6: memref<16x1xf32, #tpu.memory_space<vmem>>, %arg7: memref<16x1xf32, #tpu.memory_space<vmem>>, %arg8: memref<9x24x16xbf16, #tpu.memory_space<vmem>>, %arg9: memref<24x1xf32, #tpu.memory_space<vmem>>, %arg10: memref<9x32x24xbf16, #tpu.memory_space<vmem>>, %arg11: memref<32x1xf32, #tpu.memory_space<vmem>>, %arg12: memref<1x16x64xbf16, #tpu.memory_space<vmem>>, %arg13: memref<1x16x64xbf16, #tpu.memory_space<vmem>>, %arg14: memref<1x16x64xbf16, #tpu.memory_space<vmem>>, %arg15: memref<1x24x64xbf16, #tpu.memory_space<vmem>>, %arg16: memref<1x32x16xbf16, #tpu.memory_space<vmem>>) attributes {dimension_semantics = [#tpu.dimension_semantics<parallel>], iteration_bounds = array<i64: 2>, scalar_prefetch = 0 : i64, scratch_operands = 0 : i64, tpu.core_type = #tpu.core_type<tc>, window_params = [{transform_indices = @transform_0, window_bounds = array<i64: 1, 3, 256>}, {pipeline_mode = #tpu.pipeline_mode<synchronous>, transform_indices = @transform_1, window_bounds = array<i64: 9, 256, 64>}, {pipeline_mode = #tpu.pipeline_mode<synchronous>, transform_indices = @transform_2, window_bounds = array<i64: 9, 64, 64>}, {pipeline_mode = #tpu.pipeline_mode<synchronous>, transform_indices = @transform_3, window_bounds = array<i64: 9, 64, 16>}, {pipeline_mode = #tpu.pipeline_mode<synchronous>, transform_indices = @transform_4, window_bounds = array<i64: 9, 16, 3>}, {pipeline_mode = #tpu.pipeline_mode<synchronous>, transform_indices = @transform_5, window_bounds = array<i64: 16, 1>}, {pipeline_mode = #tpu.pipeline_mode<synchronous>, transform_indices = @transform_6, window_bounds = array<i64: 16, 1>}, {pipeline_mode = #tpu.pipeline_mode<synchronous>, transform_indices = @transform_7, window_bounds = array<i64: 9, 24, 16>}, {pipeline_mode = #tpu.pipeline_mode<synchronous>, transform_indices = @transform_8, window_bounds = array<i64: 24, 1>}, {pipeline_mode = #tpu.pipeline_mode<synchronous>, transform_indices = @transform_9, window_bounds = array<i64: 9, 32, 24>}, {pipeline_mode = #tpu.pipeline_mode<synchronous>, transform_indices = @transform_10, window_bounds = array<i64: 32, 1>}, {transform_indices = @transform_11, window_bounds = array<i64: 1, 16, 64>}, {transform_indices = @transform_12, window_bounds = array<i64: 1, 16, 64>}, {transform_indices = @transform_13, window_bounds = array<i64: 1, 16, 64>}, {transform_indices = @transform_14, window_bounds = array<i64: 1, 24, 64>}, {transform_indices = @transform_15, window_bounds = array<i64: 1, 32, 16>}]} {
    %c0 = arith.constant 0 : index
    %c0_0 = arith.constant 0 : index
    %c0_1 = arith.constant 0 : index
    %0 = vector.load %arg1[%c0, %c0_0, %c0_1] : memref<1x3x256xf32, #tpu.memory_space<vmem>>, vector<1x3x256xf32>
    %1 = vector.shape_cast %0 : vector<1x3x256xf32> to vector<3x256xf32>
    %2 = arith.truncf %1 : vector<3x256xf32> to vector<3x256xbf16>
    %cst = arith.constant 0.000000e+00 : f32
    %3 = vector.broadcast %cst : f32 to vector<16x64xf32>
    %c0_2 = arith.constant 0 : index
    %c0_3 = arith.constant 0 : index
    %c0_4 = arith.constant 0 : index
    %4 = vector.load %arg2[%c0_2, %c0_3, %c0_4] : memref<9x256x64xbf16, #tpu.memory_space<vmem>>, vector<1x256x64xbf16>
    %5 = vector.shape_cast %4 : vector<1x256x64xbf16> to vector<256x64xbf16>
    %cst_5 = arith.constant dense<0.000000e+00> : vector<3x64xf32>
    %6 = tpu.matmul %2, %5, %cst_5 {dimension_numbers = #tpu.dot_dimension_numbers<[1], [0], [0], [1], [0, 0, 1, 1], [], []>} : vector<3x256xbf16>, vector<256x64xbf16>, vector<3x64xf32> -> vector<3x64xf32>
    %c0_6 = arith.constant 0 : index
    %c0_7 = arith.constant 0 : index
    %c0_8 = arith.constant 0 : index
    %7 = vector.load %arg5[%c0_6, %c0_7, %c0_8] : memref<9x16x3xbf16, #tpu.memory_space<vmem>>, vector<1x16x3xbf16>
    %8 = vector.shape_cast %7 : vector<1x16x3xbf16> to vector<16x3xbf16>
    %9 = arith.truncf %6 : vector<3x64xf32> to vector<3x64xbf16>
    %cst_9 = arith.constant dense<0.000000e+00> : vector<16x64xf32>
    %10 = tpu.matmul %8, %9, %cst_9 {dimension_numbers = #tpu.dot_dimension_numbers<[1], [0], [0], [1], [0, 0, 1, 1], [], []>} : vector<16x3xbf16>, vector<3x64xbf16>, vector<16x64xf32> -> vector<16x64xf32>
    %11 = arith.addf %3, %10 : vector<16x64xf32>
    %c1 = arith.constant 1 : index
    %c0_10 = arith.constant 0 : index
    %c0_11 = arith.constant 0 : index
    %12 = vector.load %arg2[%c1, %c0_10, %c0_11] : memref<9x256x64xbf16, #tpu.memory_space<vmem>>, vector<1x256x64xbf16>
    %13 = vector.shape_cast %12 : vector<1x256x64xbf16> to vector<256x64xbf16>
    %cst_12 = arith.constant dense<0.000000e+00> : vector<3x64xf32>
    %14 = tpu.matmul %2, %13, %cst_12 {dimension_numbers = #tpu.dot_dimension_numbers<[1], [0], [0], [1], [0, 0, 1, 1], [], []>} : vector<3x256xbf16>, vector<256x64xbf16>, vector<3x64xf32> -> vector<3x64xf32>
    %c1_13 = arith.constant 1 : index
    %c0_14 = arith.constant 0 : index
    %c0_15 = arith.constant 0 : index
    %15 = vector.load %arg5[%c1_13, %c0_14, %c0_15] : memref<9x16x3xbf16, #tpu.memory_space<vmem>>, vector<1x16x3xbf16>
    %16 = vector.shape_cast %15 : vector<1x16x3xbf16> to vector<16x3xbf16>
    %17 = arith.truncf %14 : vector<3x64xf32> to vector<3x64xbf16>
    %cst_16 = arith.constant dense<0.000000e+00> : vector<16x64xf32>
    %18 = tpu.matmul %16, %17, %cst_16 {dimension_numbers = #tpu.dot_dimension_numbers<[1], [0], [0], [1], [0, 0, 1, 1], [], []>} : vector<16x3xbf16>, vector<3x64xbf16>, vector<16x64xf32> -> vector<16x64xf32>
    %19 = arith.addf %11, %18 : vector<16x64xf32>
    %c2 = arith.constant 2 : index
    %c0_17 = arith.constant 0 : index
    %c0_18 = arith.constant 0 : index
    %20 = vector.load %arg2[%c2, %c0_17, %c0_18] : memref<9x256x64xbf16, #tpu.memory_space<vmem>>, vector<1x256x64xbf16>
    %21 = vector.shape_cast %20 : vector<1x256x64xbf16> to vector<256x64xbf16>
    %cst_19 = arith.constant dense<0.000000e+00> : vector<3x64xf32>
    %22 = tpu.matmul %2, %21, %cst_19 {dimension_numbers = #tpu.dot_dimension_numbers<[1], [0], [0], [1], [0, 0, 1, 1], [], []>} : vector<3x256xbf16>, vector<256x64xbf16>, vector<3x64xf32> -> vector<3x64xf32>
    %c2_20 = arith.constant 2 : index
    %c0_21 = arith.constant 0 : index
    %c0_22 = arith.constant 0 : index
    %23 = vector.load %arg5[%c2_20, %c0_21, %c0_22] : memref<9x16x3xbf16, #tpu.memory_space<vmem>>, vector<1x16x3xbf16>
    %24 = vector.shape_cast %23 : vector<1x16x3xbf16> to vector<16x3xbf16>
    %25 = arith.truncf %22 : vector<3x64xf32> to vector<3x64xbf16>
    %cst_23 = arith.constant dense<0.000000e+00> : vector<16x64xf32>
    %26 = tpu.matmul %24, %25, %cst_23 {dimension_numbers = #tpu.dot_dimension_numbers<[1], [0], [0], [1], [0, 0, 1, 1], [], []>} : vector<16x3xbf16>, vector<3x64xbf16>, vector<16x64xf32> -> vector<16x64xf32>
    %27 = arith.addf %19, %26 : vector<16x64xf32>
    %c3 = arith.constant 3 : index
    %c0_24 = arith.constant 0 : index
    %c0_25 = arith.constant 0 : index
    %28 = vector.load %arg2[%c3, %c0_24, %c0_25] : memref<9x256x64xbf16, #tpu.memory_space<vmem>>, vector<1x256x64xbf16>
    %29 = vector.shape_cast %28 : vector<1x256x64xbf16> to vector<256x64xbf16>
    %cst_26 = arith.constant dense<0.000000e+00> : vector<3x64xf32>
    %30 = tpu.matmul %2, %29, %cst_26 {dimension_numbers = #tpu.dot_dimension_numbers<[1], [0], [0], [1], [0, 0, 1, 1], [], []>} : vector<3x256xbf16>, vector<256x64xbf16>, vector<3x64xf32> -> vector<3x64xf32>
    %c3_27 = arith.constant 3 : index
    %c0_28 = arith.constant 0 : index
    %c0_29 = arith.constant 0 : index
    %31 = vector.load %arg5[%c3_27, %c0_28, %c0_29] : memref<9x16x3xbf16, #tpu.memory_space<vmem>>, vector<1x16x3xbf16>
    %32 = vector.shape_cast %31 : vector<1x16x3xbf16> to vector<16x3xbf16>
    %33 = arith.truncf %30 : vector<3x64xf32> to vector<3x64xbf16>
    %cst_30 = arith.constant dense<0.000000e+00> : vector<16x64xf32>
    %34 = tpu.matmul %32, %33, %cst_30 {dimension_numbers = #tpu.dot_dimension_numbers<[1], [0], [0], [1], [0, 0, 1, 1], [], []>} : vector<16x3xbf16>, vector<3x64xbf16>, vector<16x64xf32> -> vector<16x64xf32>
    %35 = arith.addf %27, %34 : vector<16x64xf32>
    %c4 = arith.constant 4 : index
    %c0_31 = arith.constant 0 : index
    %c0_32 = arith.constant 0 : index
    %36 = vector.load %arg2[%c4, %c0_31, %c0_32] : memref<9x256x64xbf16, #tpu.memory_space<vmem>>, vector<1x256x64xbf16>
    %37 = vector.shape_cast %36 : vector<1x256x64xbf16> to vector<256x64xbf16>
    %cst_33 = arith.constant dense<0.000000e+00> : vector<3x64xf32>
    %38 = tpu.matmul %2, %37, %cst_33 {dimension_numbers = #tpu.dot_dimension_numbers<[1], [0], [0], [1], [0, 0, 1, 1], [], []>} : vector<3x256xbf16>, vector<256x64xbf16>, vector<3x64xf32> -> vector<3x64xf32>
    %c4_34 = arith.constant 4 : index
    %c0_35 = arith.constant 0 : index
    %c0_36 = arith.constant 0 : index
    %39 = vector.load %arg5[%c4_34, %c0_35, %c0_36] : memref<9x16x3xbf16, #tpu.memory_space<vmem>>, vector<1x16x3xbf16>
    %40 = vector.shape_cast %39 : vector<1x16x3xbf16> to vector<16x3xbf16>
    %41 = arith.truncf %38 : vector<3x64xf32> to vector<3x64xbf16>
    %cst_37 = arith.constant dense<0.000000e+00> : vector<16x64xf32>
    %42 = tpu.matmul %40, %41, %cst_37 {dimension_numbers = #tpu.dot_dimension_numbers<[1], [0], [0], [1], [0, 0, 1, 1], [], []>} : vector<16x3xbf16>, vector<3x64xbf16>, vector<16x64xf32> -> vector<16x64xf32>
    %43 = arith.addf %35, %42 : vector<16x64xf32>
    %c5 = arith.constant 5 : index
    %c0_38 = arith.constant 0 : index
    %c0_39 = arith.constant 0 : index
    %44 = vector.load %arg2[%c5, %c0_38, %c0_39] : memref<9x256x64xbf16, #tpu.memory_space<vmem>>, vector<1x256x64xbf16>
    %45 = vector.shape_cast %44 : vector<1x256x64xbf16> to vector<256x64xbf16>
    %cst_40 = arith.constant dense<0.000000e+00> : vector<3x64xf32>
    %46 = tpu.matmul %2, %45, %cst_40 {dimension_numbers = #tpu.dot_dimension_numbers<[1], [0], [0], [1], [0, 0, 1, 1], [], []>} : vector<3x256xbf16>, vector<256x64xbf16>, vector<3x64xf32> -> vector<3x64xf32>
    %c5_41 = arith.constant 5 : index
    %c0_42 = arith.constant 0 : index
    %c0_43 = arith.constant 0 : index
    %47 = vector.load %arg5[%c5_41, %c0_42, %c0_43] : memref<9x16x3xbf16, #tpu.memory_space<vmem>>, vector<1x16x3xbf16>
    %48 = vector.shape_cast %47 : vector<1x16x3xbf16> to vector<16x3xbf16>
    %49 = arith.truncf %46 : vector<3x64xf32> to vector<3x64xbf16>
    %cst_44 = arith.constant dense<0.000000e+00> : vector<16x64xf32>
    %50 = tpu.matmul %48, %49, %cst_44 {dimension_numbers = #tpu.dot_dimension_numbers<[1], [0], [0], [1], [0, 0, 1, 1], [], []>} : vector<16x3xbf16>, vector<3x64xbf16>, vector<16x64xf32> -> vector<16x64xf32>
    %51 = arith.addf %43, %50 : vector<16x64xf32>
    %c6 = arith.constant 6 : index
    %c0_45 = arith.constant 0 : index
    %c0_46 = arith.constant 0 : index
    %52 = vector.load %arg2[%c6, %c0_45, %c0_46] : memref<9x256x64xbf16, #tpu.memory_space<vmem>>, vector<1x256x64xbf16>
    %53 = vector.shape_cast %52 : vector<1x256x64xbf16> to vector<256x64xbf16>
    %cst_47 = arith.constant dense<0.000000e+00> : vector<3x64xf32>
    %54 = tpu.matmul %2, %53, %cst_47 {dimension_numbers = #tpu.dot_dimension_numbers<[1], [0], [0], [1], [0, 0, 1, 1], [], []>} : vector<3x256xbf16>, vector<256x64xbf16>, vector<3x64xf32> -> vector<3x64xf32>
    %c6_48 = arith.constant 6 : index
    %c0_49 = arith.constant 0 : index
    %c0_50 = arith.constant 0 : index
    %55 = vector.load %arg5[%c6_48, %c0_49, %c0_50] : memref<9x16x3xbf16, #tpu.memory_space<vmem>>, vector<1x16x3xbf16>
    %56 = vector.shape_cast %55 : vector<1x16x3xbf16> to vector<16x3xbf16>
    %57 = arith.truncf %54 : vector<3x64xf32> to vector<3x64xbf16>
    %cst_51 = arith.constant dense<0.000000e+00> : vector<16x64xf32>
    %58 = tpu.matmul %56, %57, %cst_51 {dimension_numbers = #tpu.dot_dimension_numbers<[1], [0], [0], [1], [0, 0, 1, 1], [], []>} : vector<16x3xbf16>, vector<3x64xbf16>, vector<16x64xf32> -> vector<16x64xf32>
    %59 = arith.addf %51, %58 : vector<16x64xf32>
    %c7 = arith.constant 7 : index
    %c0_52 = arith.constant 0 : index
    %c0_53 = arith.constant 0 : index
    %60 = vector.load %arg2[%c7, %c0_52, %c0_53] : memref<9x256x64xbf16, #tpu.memory_space<vmem>>, vector<1x256x64xbf16>
    %61 = vector.shape_cast %60 : vector<1x256x64xbf16> to vector<256x64xbf16>
    %cst_54 = arith.constant dense<0.000000e+00> : vector<3x64xf32>
    %62 = tpu.matmul %2, %61, %cst_54 {dimension_numbers = #tpu.dot_dimension_numbers<[1], [0], [0], [1], [0, 0, 1, 1], [], []>} : vector<3x256xbf16>, vector<256x64xbf16>, vector<3x64xf32> -> vector<3x64xf32>
    %c7_55 = arith.constant 7 : index
    %c0_56 = arith.constant 0 : index
    %c0_57 = arith.constant 0 : index
    %63 = vector.load %arg5[%c7_55, %c0_56, %c0_57] : memref<9x16x3xbf16, #tpu.memory_space<vmem>>, vector<1x16x3xbf16>
    %64 = vector.shape_cast %63 : vector<1x16x3xbf16> to vector<16x3xbf16>
    %65 = arith.truncf %62 : vector<3x64xf32> to vector<3x64xbf16>
    %cst_58 = arith.constant dense<0.000000e+00> : vector<16x64xf32>
    %66 = tpu.matmul %64, %65, %cst_58 {dimension_numbers = #tpu.dot_dimension_numbers<[1], [0], [0], [1], [0, 0, 1, 1], [], []>} : vector<16x3xbf16>, vector<3x64xbf16>, vector<16x64xf32> -> vector<16x64xf32>
    %67 = arith.addf %59, %66 : vector<16x64xf32>
    %c8 = arith.constant 8 : index
    %c0_59 = arith.constant 0 : index
    %c0_60 = arith.constant 0 : index
    %68 = vector.load %arg2[%c8, %c0_59, %c0_60] : memref<9x256x64xbf16, #tpu.memory_space<vmem>>, vector<1x256x64xbf16>
    %69 = vector.shape_cast %68 : vector<1x256x64xbf16> to vector<256x64xbf16>
    %cst_61 = arith.constant dense<0.000000e+00> : vector<3x64xf32>
    %70 = tpu.matmul %2, %69, %cst_61 {dimension_numbers = #tpu.dot_dimension_numbers<[1], [0], [0], [1], [0, 0, 1, 1], [], []>} : vector<3x256xbf16>, vector<256x64xbf16>, vector<3x64xf32> -> vector<3x64xf32>
    %c8_62 = arith.constant 8 : index
    %c0_63 = arith.constant 0 : index
    %c0_64 = arith.constant 0 : index
    %71 = vector.load %arg5[%c8_62, %c0_63, %c0_64] : memref<9x16x3xbf16, #tpu.memory_space<vmem>>, vector<1x16x3xbf16>
    %72 = vector.shape_cast %71 : vector<1x16x3xbf16> to vector<16x3xbf16>
    %73 = arith.truncf %70 : vector<3x64xf32> to vector<3x64xbf16>
    %cst_65 = arith.constant dense<0.000000e+00> : vector<16x64xf32>
    %74 = tpu.matmul %72, %73, %cst_65 {dimension_numbers = #tpu.dot_dimension_numbers<[1], [0], [0], [1], [0, 0, 1, 1], [], []>} : vector<16x3xbf16>, vector<3x64xbf16>, vector<16x64xf32> -> vector<16x64xf32>
    %75 = arith.addf %67, %74 : vector<16x64xf32>
    %76 = arith.truncf %75 : vector<16x64xf32> to vector<16x64xbf16>
    %c0_66 = arith.constant 0 : index
    %c0_67 = arith.constant 0 : index
    %c0_68 = arith.constant 0 : index
    %77 = vector.load %arg12[%c0_66, %c0_67, %c0_68] : memref<1x16x64xbf16, #tpu.memory_space<vmem>>, vector<1x16x64xbf16>
    %78 = vector.shape_cast %77 : vector<1x16x64xbf16> to vector<16x64xbf16>
    %79 = vector.shape_cast %76 : vector<16x64xbf16> to vector<1x16x64xbf16>
    tpu.vector_store %arg12[%c0_66, %c0_67, %c0_68], %79 {strides = array<i32>} : memref<1x16x64xbf16, #tpu.memory_space<vmem>>, vector<1x16x64xbf16>,
    %c0_69 = arith.constant 0 : index
    %c0_70 = arith.constant 0 : index
    %80 = vector.load %arg6[%c0_69, %c0_70] : memref<16x1xf32, #tpu.memory_space<vmem>>, vector<16x1xf32>
    %81 = vector.broadcast %80 : vector<16x1xf32> to vector<16x64xf32>
    %82 = arith.mulf %75, %81 : vector<16x64xf32>
    %c0_71 = arith.constant 0 : index
    %c0_72 = arith.constant 0 : index
    %83 = vector.load %arg7[%c0_71, %c0_72] : memref<16x1xf32, #tpu.memory_space<vmem>>, vector<16x1xf32>
    %84 = vector.broadcast %83 : vector<16x1xf32> to vector<16x64xf32>
    %85 = arith.addf %82, %84 : vector<16x64xf32>
    %86 = arith.truncf %85 : vector<16x64xf32> to vector<16x64xbf16>
    %c0_73 = arith.constant 0 : index
    %c0_74 = arith.constant 0 : index
    %c0_75 = arith.constant 0 : index
    %87 = vector.load %arg13[%c0_73, %c0_74, %c0_75] : memref<1x16x64xbf16, #tpu.memory_space<vmem>>, vector<1x16x64xbf16>
    %88 = vector.shape_cast %87 : vector<1x16x64xbf16> to vector<16x64xbf16>
    %89 = vector.shape_cast %86 : vector<16x64xbf16> to vector<1x16x64xbf16>
    tpu.vector_store %arg13[%c0_73, %c0_74, %c0_75], %89 {strides = array<i32>} : memref<1x16x64xbf16, #tpu.memory_space<vmem>>, vector<1x16x64xbf16>,
    %cst_76 = arith.constant 0.000000e+00 : f32
    %90 = vector.broadcast %cst_76 : f32 to vector<16x64xf32>
    %91 = arith.subf %90, %85 : vector<16x64xf32>
    %92 = math.exp %91 : vector<16x64xf32>
    %cst_77 = arith.constant 1.000000e+00 : f32
    %93 = vector.broadcast %cst_77 : f32 to vector<16x64xf32>
    %94 = arith.addf %93, %92 : vector<16x64xf32>
    %95 = tpu.reciprocal %94 {approx = true} : vector<16x64xf32> -> vector<16x64xf32>
    %96 = arith.mulf %85, %95 : vector<16x64xf32>
    %97 = arith.truncf %96 : vector<16x64xf32> to vector<16x64xbf16>
    %c0_78 = arith.constant 0 : index
    %c0_79 = arith.constant 0 : index
    %c0_80 = arith.constant 0 : index
    %98 = vector.load %arg14[%c0_78, %c0_79, %c0_80] : memref<1x16x64xbf16, #tpu.memory_space<vmem>>, vector<1x16x64xbf16>
    %99 = vector.shape_cast %98 : vector<1x16x64xbf16> to vector<16x64xbf16>
    %100 = vector.shape_cast %97 : vector<16x64xbf16> to vector<1x16x64xbf16>
    tpu.vector_store %arg14[%c0_78, %c0_79, %c0_80], %100 {strides = array<i32>} : memref<1x16x64xbf16, #tpu.memory_space<vmem>>, vector<1x16x64xbf16>,
    %101 = arith.truncf %96 : vector<16x64xf32> to vector<16x64xbf16>
    %cst_81 = arith.constant 0.000000e+00 : f32
    %102 = vector.broadcast %cst_81 : f32 to vector<24x64xf32>
    %c0_82 = arith.constant 0 : index
    %c0_83 = arith.constant 0 : index
    %c0_84 = arith.constant 0 : index
    %103 = vector.load %arg3[%c0_82, %c0_83, %c0_84] : memref<9x64x64xbf16, #tpu.memory_space<vmem>>, vector<1x64x64xbf16>
    %104 = vector.shape_cast %103 : vector<1x64x64xbf16> to vector<64x64xbf16>
    %cst_85 = arith.constant dense<0.000000e+00> : vector<16x64xf32>
    %105 = tpu.matmul %101, %104, %cst_85 {dimension_numbers = #tpu.dot_dimension_numbers<[1], [0], [0], [1], [0, 0, 1, 1], [], []>} : vector<16x64xbf16>, vector<64x64xbf16>, vector<16x64xf32> -> vector<16x64xf32>
    %c0_86 = arith.constant 0 : index
    %c0_87 = arith.constant 0 : index
    %c0_88 = arith.constant 0 : index
    %106 = vector.load %arg8[%c0_86, %c0_87, %c0_88] : memref<9x24x16xbf16, #tpu.memory_space<vmem>>, vector<1x24x16xbf16>
    %107 = vector.shape_cast %106 : vector<1x24x16xbf16> to vector<24x16xbf16>
    %108 = arith.truncf %105 : vector<16x64xf32> to vector<16x64xbf16>
    %cst_89 = arith.constant dense<0.000000e+00> : vector<24x64xf32>
    %109 = tpu.matmul %107, %108, %cst_89 {dimension_numbers = #tpu.dot_dimension_numbers<[1], [0], [0], [1], [0, 0, 1, 1], [], []>} : vector<24x16xbf16>, vector<16x64xbf16>, vector<24x64xf32> -> vector<24x64xf32>
    %110 = arith.addf %102, %109 : vector<24x64xf32>
    %c1_90 = arith.constant 1 : index
    %c0_91 = arith.constant 0 : index
    %c0_92 = arith.constant 0 : index
    %111 = vector.load %arg3[%c1_90, %c0_91, %c0_92] : memref<9x64x64xbf16, #tpu.memory_space<vmem>>, vector<1x64x64xbf16>
    %112 = vector.shape_cast %111 : vector<1x64x64xbf16> to vector<64x64xbf16>
    %cst_93 = arith.constant dense<0.000000e+00> : vector<16x64xf32>
    %113 = tpu.matmul %101, %112, %cst_93 {dimension_numbers = #tpu.dot_dimension_numbers<[1], [0], [0], [1], [0, 0, 1, 1], [], []>} : vector<16x64xbf16>, vector<64x64xbf16>, vector<16x64xf32> -> vector<16x64xf32>
    %c1_94 = arith.constant 1 : index
    %c0_95 = arith.constant 0 : index
    %c0_96 = arith.constant 0 : index
    %114 = vector.load %arg8[%c1_94, %c0_95, %c0_96] : memref<9x24x16xbf16, #tpu.memory_space<vmem>>, vector<1x24x16xbf16>
    %115 = vector.shape_cast %114 : vector<1x24x16xbf16> to vector<24x16xbf16>
    %116 = arith.truncf %113 : vector<16x64xf32> to vector<16x64xbf16>
    %cst_97 = arith.constant dense<0.000000e+00> : vector<24x64xf32>
    %117 = tpu.matmul %115, %116, %cst_97 {dimension_numbers = #tpu.dot_dimension_numbers<[1], [0], [0], [1], [0, 0, 1, 1], [], []>} : vector<24x16xbf16>, vector<16x64xbf16>, vector<24x64xf32> -> vector<24x64xf32>
    %118 = arith.addf %110, %117 : vector<24x64xf32>
    %c2_98 = arith.constant 2 : index
    %c0_99 = arith.constant 0 : index
    %c0_100 = arith.constant 0 : index
    %119 = vector.load %arg3[%c2_98, %c0_99, %c0_100] : memref<9x64x64xbf16, #tpu.memory_space<vmem>>, vector<1x64x64xbf16>
    %120 = vector.shape_cast %119 : vector<1x64x64xbf16> to vector<64x64xbf16>
    %cst_101 = arith.constant dense<0.000000e+00> : vector<16x64xf32>
    %121 = tpu.matmul %101, %120, %cst_101 {dimension_numbers = #tpu.dot_dimension_numbers<[1], [0], [0], [1], [0, 0, 1, 1], [], []>} : vector<16x64xbf16>, vector<64x64xbf16>, vector<16x64xf32> -> vector<16x64xf32>
    %c2_102 = arith.constant 2 : index
    %c0_103 = arith.constant 0 : index
    %c0_104 = arith.constant 0 : index
    %122 = vector.load %arg8[%c2_102, %c0_103, %c0_104] : memref<9x24x16xbf16, #tpu.memory_space<vmem>>, vector<1x24x16xbf16>
    %123 = vector.shape_cast %122 : vector<1x24x16xbf16> to vector<24x16xbf16>
    %124 = arith.truncf %121 : vector<16x64xf32> to vector<16x64xbf16>
    %cst_105 = arith.constant dense<0.000000e+00> : vector<24x64xf32>
    %125 = tpu.matmul %123, %124, %cst_105 {dimension_numbers = #tpu.dot_dimension_numbers<[1], [0], [0], [1], [0, 0, 1, 1], [], []>} : vector<24x16xbf16>, vector<16x64xbf16>, vector<24x64xf32> -> vector<24x64xf32>
    %126 = arith.addf %118, %125 : vector<24x64xf32>
    %c3_106 = arith.constant 3 : index
    %c0_107 = arith.constant 0 : index
    %c0_108 = arith.constant 0 : index
    %127 = vector.load %arg3[%c3_106, %c0_107, %c0_108] : memref<9x64x64xbf16, #tpu.memory_space<vmem>>, vector<1x64x64xbf16>
    %128 = vector.shape_cast %127 : vector<1x64x64xbf16> to vector<64x64xbf16>
    %cst_109 = arith.constant dense<0.000000e+00> : vector<16x64xf32>
    %129 = tpu.matmul %101, %128, %cst_109 {dimension_numbers = #tpu.dot_dimension_numbers<[1], [0], [0], [1], [0, 0, 1, 1], [], []>} : vector<16x64xbf16>, vector<64x64xbf16>, vector<16x64xf32> -> vector<16x64xf32>
    %c3_110 = arith.constant 3 : index
    %c0_111 = arith.constant 0 : index
    %c0_112 = arith.constant 0 : index
    %130 = vector.load %arg8[%c3_110, %c0_111, %c0_112] : memref<9x24x16xbf16, #tpu.memory_space<vmem>>, vector<1x24x16xbf16>
    %131 = vector.shape_cast %130 : vector<1x24x16xbf16> to vector<24x16xbf16>
    %132 = arith.truncf %129 : vector<16x64xf32> to vector<16x64xbf16>
    %cst_113 = arith.constant dense<0.000000e+00> : vector<24x64xf32>
    %133 = tpu.matmul %131, %132, %cst_113 {dimension_numbers = #tpu.dot_dimension_numbers<[1], [0], [0], [1], [0, 0, 1, 1], [], []>} : vector<24x16xbf16>, vector<16x64xbf16>, vector<24x64xf32> -> vector<24x64xf32>
    %134 = arith.addf %126, %133 : vector<24x64xf32>
    %c4_114 = arith.constant 4 : index
    %c0_115 = arith.constant 0 : index
    %c0_116 = arith.constant 0 : index
    %135 = vector.load %arg3[%c4_114, %c0_115, %c0_116] : memref<9x64x64xbf16, #tpu.memory_space<vmem>>, vector<1x64x64xbf16>
    %136 = vector.shape_cast %135 : vector<1x64x64xbf16> to vector<64x64xbf16>
    %cst_117 = arith.constant dense<0.000000e+00> : vector<16x64xf32>
    %137 = tpu.matmul %101, %136, %cst_117 {dimension_numbers = #tpu.dot_dimension_numbers<[1], [0], [0], [1], [0, 0, 1, 1], [], []>} : vector<16x64xbf16>, vector<64x64xbf16>, vector<16x64xf32> -> vector<16x64xf32>
    %c4_118 = arith.constant 4 : index
    %c0_119 = arith.constant 0 : index
    %c0_120 = arith.constant 0 : index
    %138 = vector.load %arg8[%c4_118, %c0_119, %c0_120] : memref<9x24x16xbf16, #tpu.memory_space<vmem>>, vector<1x24x16xbf16>
    %139 = vector.shape_cast %138 : vector<1x24x16xbf16> to vector<24x16xbf16>
    %140 = arith.truncf %137 : vector<16x64xf32> to vector<16x64xbf16>
    %cst_121 = arith.constant dense<0.000000e+00> : vector<24x64xf32>
    %141 = tpu.matmul %139, %140, %cst_121 {dimension_numbers = #tpu.dot_dimension_numbers<[1], [0], [0], [1], [0, 0, 1, 1], [], []>} : vector<24x16xbf16>, vector<16x64xbf16>, vector<24x64xf32> -> vector<24x64xf32>
    %142 = arith.addf %134, %141 : vector<24x64xf32>
    %c5_122 = arith.constant 5 : index
    %c0_123 = arith.constant 0 : index
    %c0_124 = arith.constant 0 : index
    %143 = vector.load %arg3[%c5_122, %c0_123, %c0_124] : memref<9x64x64xbf16, #tpu.memory_space<vmem>>, vector<1x64x64xbf16>
    %144 = vector.shape_cast %143 : vector<1x64x64xbf16> to vector<64x64xbf16>
    %cst_125 = arith.constant dense<0.000000e+00> : vector<16x64xf32>
    %145 = tpu.matmul %101, %144, %cst_125 {dimension_numbers = #tpu.dot_dimension_numbers<[1], [0], [0], [1], [0, 0, 1, 1], [], []>} : vector<16x64xbf16>, vector<64x64xbf16>, vector<16x64xf32> -> vector<16x64xf32>
    %c5_126 = arith.constant 5 : index
    %c0_127 = arith.constant 0 : index
    %c0_128 = arith.constant 0 : index
    %146 = vector.load %arg8[%c5_126, %c0_127, %c0_128] : memref<9x24x16xbf16, #tpu.memory_space<vmem>>, vector<1x24x16xbf16>
    %147 = vector.shape_cast %146 : vector<1x24x16xbf16> to vector<24x16xbf16>
    %148 = arith.truncf %145 : vector<16x64xf32> to vector<16x64xbf16>
    %cst_129 = arith.constant dense<0.000000e+00> : vector<24x64xf32>
    %149 = tpu.matmul %147, %148, %cst_129 {dimension_numbers = #tpu.dot_dimension_numbers<[1], [0], [0], [1], [0, 0, 1, 1], [], []>} : vector<24x16xbf16>, vector<16x64xbf16>, vector<24x64xf32> -> vector<24x64xf32>
    %150 = arith.addf %142, %149 : vector<24x64xf32>
    %c6_130 = arith.constant 6 : index
    %c0_131 = arith.constant 0 : index
    %c0_132 = arith.constant 0 : index
    %151 = vector.load %arg3[%c6_130, %c0_131, %c0_132] : memref<9x64x64xbf16, #tpu.memory_space<vmem>>, vector<1x64x64xbf16>
    %152 = vector.shape_cast %151 : vector<1x64x64xbf16> to vector<64x64xbf16>
    %cst_133 = arith.constant dense<0.000000e+00> : vector<16x64xf32>
    %153 = tpu.matmul %101, %152, %cst_133 {dimension_numbers = #tpu.dot_dimension_numbers<[1], [0], [0], [1], [0, 0, 1, 1], [], []>} : vector<16x64xbf16>, vector<64x64xbf16>, vector<16x64xf32> -> vector<16x64xf32>
    %c6_134 = arith.constant 6 : index
    %c0_135 = arith.constant 0 : index
    %c0_136 = arith.constant 0 : index
    %154 = vector.load %arg8[%c6_134, %c0_135, %c0_136] : memref<9x24x16xbf16, #tpu.memory_space<vmem>>, vector<1x24x16xbf16>
    %155 = vector.shape_cast %154 : vector<1x24x16xbf16> to vector<24x16xbf16>
    %156 = arith.truncf %153 : vector<16x64xf32> to vector<16x64xbf16>
    %cst_137 = arith.constant dense<0.000000e+00> : vector<24x64xf32>
    %157 = tpu.matmul %155, %156, %cst_137 {dimension_numbers = #tpu.dot_dimension_numbers<[1], [0], [0], [1], [0, 0, 1, 1], [], []>} : vector<24x16xbf16>, vector<16x64xbf16>, vector<24x64xf32> -> vector<24x64xf32>
    %158 = arith.addf %150, %157 : vector<24x64xf32>
    %c7_138 = arith.constant 7 : index
    %c0_139 = arith.constant 0 : index
    %c0_140 = arith.constant 0 : index
    %159 = vector.load %arg3[%c7_138, %c0_139, %c0_140] : memref<9x64x64xbf16, #tpu.memory_space<vmem>>, vector<1x64x64xbf16>
    %160 = vector.shape_cast %159 : vector<1x64x64xbf16> to vector<64x64xbf16>
    %cst_141 = arith.constant dense<0.000000e+00> : vector<16x64xf32>
    %161 = tpu.matmul %101, %160, %cst_141 {dimension_numbers = #tpu.dot_dimension_numbers<[1], [0], [0], [1], [0, 0, 1, 1], [], []>} : vector<16x64xbf16>, vector<64x64xbf16>, vector<16x64xf32> -> vector<16x64xf32>
    %c7_142 = arith.constant 7 : index
    %c0_143 = arith.constant 0 : index
    %c0_144 = arith.constant 0 : index
    %162 = vector.load %arg8[%c7_142, %c0_143, %c0_144] : memref<9x24x16xbf16, #tpu.memory_space<vmem>>, vector<1x24x16xbf16>
    %163 = vector.shape_cast %162 : vector<1x24x16xbf16> to vector<24x16xbf16>
    %164 = arith.truncf %161 : vector<16x64xf32> to vector<16x64xbf16>
    %cst_145 = arith.constant dense<0.000000e+00> : vector<24x64xf32>
    %165 = tpu.matmul %163, %164, %cst_145 {dimension_numbers = #tpu.dot_dimension_numbers<[1], [0], [0], [1], [0, 0, 1, 1], [], []>} : vector<24x16xbf16>, vector<16x64xbf16>, vector<24x64xf32> -> vector<24x64xf32>
    %166 = arith.addf %158, %165 : vector<24x64xf32>
    %c8_146 = arith.constant 8 : index
    %c0_147 = arith.constant 0 : index
    %c0_148 = arith.constant 0 : index
    %167 = vector.load %arg3[%c8_146, %c0_147, %c0_148] : memref<9x64x64xbf16, #tpu.memory_space<vmem>>, vector<1x64x64xbf16>
    %168 = vector.shape_cast %167 : vector<1x64x64xbf16> to vector<64x64xbf16>
    %cst_149 = arith.constant dense<0.000000e+00> : vector<16x64xf32>
    %169 = tpu.matmul %101, %168, %cst_149 {dimension_numbers = #tpu.dot_dimension_numbers<[1], [0], [0], [1], [0, 0, 1, 1], [], []>} : vector<16x64xbf16>, vector<64x64xbf16>, vector<16x64xf32> -> vector<16x64xf32>
    %c8_150 = arith.constant 8 : index
    %c0_151 = arith.constant 0 : index
    %c0_152 = arith.constant 0 : index
    %170 = vector.load %arg8[%c8_150, %c0_151, %c0_152] : memref<9x24x16xbf16, #tpu.memory_space<vmem>>, vector<1x24x16xbf16>
    %171 = vector.shape_cast %170 : vector<1x24x16xbf16> to vector<24x16xbf16>
    %172 = arith.truncf %169 : vector<16x64xf32> to vector<16x64xbf16>
    %cst_153 = arith.constant dense<0.000000e+00> : vector<24x64xf32>
    %173 = tpu.matmul %171, %172, %cst_153 {dimension_numbers = #tpu.dot_dimension_numbers<[1], [0], [0], [1], [0, 0, 1, 1], [], []>} : vector<24x16xbf16>, vector<16x64xbf16>, vector<24x64xf32> -> vector<24x64xf32>
    %174 = arith.addf %166, %173 : vector<24x64xf32>
    %c0_154 = arith.constant 0 : index
    %c0_155 = arith.constant 0 : index
    %175 = vector.load %arg9[%c0_154, %c0_155] : memref<24x1xf32, #tpu.memory_space<vmem>>, vector<24x1xf32>
    %176 = vector.broadcast %175 : vector<24x1xf32> to vector<24x64xf32>
    %177 = arith.addf %174, %176 : vector<24x64xf32>
    %cst_156 = arith.constant 0.000000e+00 : f32
    %178 = vector.broadcast %cst_156 : f32 to vector<24x64xf32>
    %179 = arith.subf %178, %177 : vector<24x64xf32>
    %180 = math.exp %179 : vector<24x64xf32>
    %cst_157 = arith.constant 1.000000e+00 : f32
    %181 = vector.broadcast %cst_157 : f32 to vector<24x64xf32>
    %182 = arith.addf %181, %180 : vector<24x64xf32>
    %183 = tpu.reciprocal %182 {approx = true} : vector<24x64xf32> -> vector<24x64xf32>
    %184 = arith.mulf %177, %183 : vector<24x64xf32>
    %185 = arith.truncf %184 : vector<24x64xf32> to vector<24x64xbf16>
    %c0_158 = arith.constant 0 : index
    %c0_159 = arith.constant 0 : index
    %c0_160 = arith.constant 0 : index
    %186 = vector.load %arg15[%c0_158, %c0_159, %c0_160] : memref<1x24x64xbf16, #tpu.memory_space<vmem>>, vector<1x24x64xbf16>
    %187 = vector.shape_cast %186 : vector<1x24x64xbf16> to vector<24x64xbf16>
    %188 = vector.shape_cast %185 : vector<24x64xbf16> to vector<1x24x64xbf16>
    tpu.vector_store %arg15[%c0_158, %c0_159, %c0_160], %188 {strides = array<i32>} : memref<1x24x64xbf16, #tpu.memory_space<vmem>>, vector<1x24x64xbf16>,
    %189 = arith.truncf %184 : vector<24x64xf32> to vector<24x64xbf16>
    %cst_161 = arith.constant 0.000000e+00 : f32
    %190 = vector.broadcast %cst_161 : f32 to vector<32x16xf32>
    %c0_162 = arith.constant 0 : index
    %c0_163 = arith.constant 0 : index
    %c0_164 = arith.constant 0 : index
    %191 = vector.load %arg4[%c0_162, %c0_163, %c0_164] : memref<9x64x16xbf16, #tpu.memory_space<vmem>>, vector<1x64x16xbf16>
    %192 = vector.shape_cast %191 : vector<1x64x16xbf16> to vector<64x16xbf16>
    %cst_165 = arith.constant dense<0.000000e+00> : vector<24x16xf32>
    %193 = tpu.matmul %189, %192, %cst_165 {dimension_numbers = #tpu.dot_dimension_numbers<[1], [0], [0], [1], [0, 0, 1, 1], [], []>} : vector<24x64xbf16>, vector<64x16xbf16>, vector<24x16xf32> -> vector<24x16xf32>
    %c0_166 = arith.constant 0 : index
    %c0_167 = arith.constant 0 : index
    %c0_168 = arith.constant 0 : index
    %194 = vector.load %arg10[%c0_166, %c0_167, %c0_168] : memref<9x32x24xbf16, #tpu.memory_space<vmem>>, vector<1x32x24xbf16>
    %195 = vector.shape_cast %194 : vector<1x32x24xbf16> to vector<32x24xbf16>
    %196 = arith.truncf %193 : vector<24x16xf32> to vector<24x16xbf16>
    %cst_169 = arith.constant dense<0.000000e+00> : vector<32x16xf32>
    %197 = tpu.matmul %195, %196, %cst_169 {dimension_numbers = #tpu.dot_dimension_numbers<[1], [0], [0], [1], [0, 0, 1, 1], [], []>} : vector<32x24xbf16>, vector<24x16xbf16>, vector<32x16xf32> -> vector<32x16xf32>
    %198 = arith.addf %190, %197 : vector<32x16xf32>
    %c1_170 = arith.constant 1 : index
    %c0_171 = arith.constant 0 : index
    %c0_172 = arith.constant 0 : index
    %199 = vector.load %arg4[%c1_170, %c0_171, %c0_172] : memref<9x64x16xbf16, #tpu.memory_space<vmem>>, vector<1x64x16xbf16>
    %200 = vector.shape_cast %199 : vector<1x64x16xbf16> to vector<64x16xbf16>
    %cst_173 = arith.constant dense<0.000000e+00> : vector<24x16xf32>
    %201 = tpu.matmul %189, %200, %cst_173 {dimension_numbers = #tpu.dot_dimension_numbers<[1], [0], [0], [1], [0, 0, 1, 1], [], []>} : vector<24x64xbf16>, vector<64x16xbf16>, vector<24x16xf32> -> vector<24x16xf32>
    %c1_174 = arith.constant 1 : index
    %c0_175 = arith.constant 0 : index
    %c0_176 = arith.constant 0 : index
    %202 = vector.load %arg10[%c1_174, %c0_175, %c0_176] : memref<9x32x24xbf16, #tpu.memory_space<vmem>>, vector<1x32x24xbf16>
    %203 = vector.shape_cast %202 : vector<1x32x24xbf16> to vector<32x24xbf16>
    %204 = arith.truncf %201 : vector<24x16xf32> to vector<24x16xbf16>
    %cst_177 = arith.constant dense<0.000000e+00> : vector<32x16xf32>
    %205 = tpu.matmul %203, %204, %cst_177 {dimension_numbers = #tpu.dot_dimension_numbers<[1], [0], [0], [1], [0, 0, 1, 1], [], []>} : vector<32x24xbf16>, vector<24x16xbf16>, vector<32x16xf32> -> vector<32x16xf32>
    %206 = arith.addf %198, %205 : vector<32x16xf32>
    %c2_178 = arith.constant 2 : index
    %c0_179 = arith.constant 0 : index
    %c0_180 = arith.constant 0 : index
    %207 = vector.load %arg4[%c2_178, %c0_179, %c0_180] : memref<9x64x16xbf16, #tpu.memory_space<vmem>>, vector<1x64x16xbf16>
    %208 = vector.shape_cast %207 : vector<1x64x16xbf16> to vector<64x16xbf16>
    %cst_181 = arith.constant dense<0.000000e+00> : vector<24x16xf32>
    %209 = tpu.matmul %189, %208, %cst_181 {dimension_numbers = #tpu.dot_dimension_numbers<[1], [0], [0], [1], [0, 0, 1, 1], [], []>} : vector<24x64xbf16>, vector<64x16xbf16>, vector<24x16xf32> -> vector<24x16xf32>
    %c2_182 = arith.constant 2 : index
    %c0_183 = arith.constant 0 : index
    %c0_184 = arith.constant 0 : index
    %210 = vector.load %arg10[%c2_182, %c0_183, %c0_184] : memref<9x32x24xbf16, #tpu.memory_space<vmem>>, vector<1x32x24xbf16>
    %211 = vector.shape_cast %210 : vector<1x32x24xbf16> to vector<32x24xbf16>
    %212 = arith.truncf %209 : vector<24x16xf32> to vector<24x16xbf16>
    %cst_185 = arith.constant dense<0.000000e+00> : vector<32x16xf32>
    %213 = tpu.matmul %211, %212, %cst_185 {dimension_numbers = #tpu.dot_dimension_numbers<[1], [0], [0], [1], [0, 0, 1, 1], [], []>} : vector<32x24xbf16>, vector<24x16xbf16>, vector<32x16xf32> -> vector<32x16xf32>
    %214 = arith.addf %206, %213 : vector<32x16xf32>
    %c3_186 = arith.constant 3 : index
    %c0_187 = arith.constant 0 : index
    %c0_188 = arith.constant 0 : index
    %215 = vector.load %arg4[%c3_186, %c0_187, %c0_188] : memref<9x64x16xbf16, #tpu.memory_space<vmem>>, vector<1x64x16xbf16>
    %216 = vector.shape_cast %215 : vector<1x64x16xbf16> to vector<64x16xbf16>
    %cst_189 = arith.constant dense<0.000000e+00> : vector<24x16xf32>
    %217 = tpu.matmul %189, %216, %cst_189 {dimension_numbers = #tpu.dot_dimension_numbers<[1], [0], [0], [1], [0, 0, 1, 1], [], []>} : vector<24x64xbf16>, vector<64x16xbf16>, vector<24x16xf32> -> vector<24x16xf32>
    %c3_190 = arith.constant 3 : index
    %c0_191 = arith.constant 0 : index
    %c0_192 = arith.constant 0 : index
    %218 = vector.load %arg10[%c3_190, %c0_191, %c0_192] : memref<9x32x24xbf16, #tpu.memory_space<vmem>>, vector<1x32x24xbf16>
    %219 = vector.shape_cast %218 : vector<1x32x24xbf16> to vector<32x24xbf16>
    %220 = arith.truncf %217 : vector<24x16xf32> to vector<24x16xbf16>
    %cst_193 = arith.constant dense<0.000000e+00> : vector<32x16xf32>
    %221 = tpu.matmul %219, %220, %cst_193 {dimension_numbers = #tpu.dot_dimension_numbers<[1], [0], [0], [1], [0, 0, 1, 1], [], []>} : vector<32x24xbf16>, vector<24x16xbf16>, vector<32x16xf32> -> vector<32x16xf32>
    %222 = arith.addf %214, %221 : vector<32x16xf32>
    %c4_194 = arith.constant 4 : index
    %c0_195 = arith.constant 0 : index
    %c0_196 = arith.constant 0 : index
    %223 = vector.load %arg4[%c4_194, %c0_195, %c0_196] : memref<9x64x16xbf16, #tpu.memory_space<vmem>>, vector<1x64x16xbf16>
    %224 = vector.shape_cast %223 : vector<1x64x16xbf16> to vector<64x16xbf16>
    %cst_197 = arith.constant dense<0.000000e+00> : vector<24x16xf32>
    %225 = tpu.matmul %189, %224, %cst_197 {dimension_numbers = #tpu.dot_dimension_numbers<[1], [0], [0], [1], [0, 0, 1, 1], [], []>} : vector<24x64xbf16>, vector<64x16xbf16>, vector<24x16xf32> -> vector<24x16xf32>
    %c4_198 = arith.constant 4 : index
    %c0_199 = arith.constant 0 : index
    %c0_200 = arith.constant 0 : index
    %226 = vector.load %arg10[%c4_198, %c0_199, %c0_200] : memref<9x32x24xbf16, #tpu.memory_space<vmem>>, vector<1x32x24xbf16>
    %227 = vector.shape_cast %226 : vector<1x32x24xbf16> to vector<32x24xbf16>
    %228 = arith.truncf %225 : vector<24x16xf32> to vector<24x16xbf16>
    %cst_201 = arith.constant dense<0.000000e+00> : vector<32x16xf32>
    %229 = tpu.matmul %227, %228, %cst_201 {dimension_numbers = #tpu.dot_dimension_numbers<[1], [0], [0], [1], [0, 0, 1, 1], [], []>} : vector<32x24xbf16>, vector<24x16xbf16>, vector<32x16xf32> -> vector<32x16xf32>
    %230 = arith.addf %222, %229 : vector<32x16xf32>
    %c5_202 = arith.constant 5 : index
    %c0_203 = arith.constant 0 : index
    %c0_204 = arith.constant 0 : index
    %231 = vector.load %arg4[%c5_202, %c0_203, %c0_204] : memref<9x64x16xbf16, #tpu.memory_space<vmem>>, vector<1x64x16xbf16>
    %232 = vector.shape_cast %231 : vector<1x64x16xbf16> to vector<64x16xbf16>
    %cst_205 = arith.constant dense<0.000000e+00> : vector<24x16xf32>
    %233 = tpu.matmul %189, %232, %cst_205 {dimension_numbers = #tpu.dot_dimension_numbers<[1], [0], [0], [1], [0, 0, 1, 1], [], []>} : vector<24x64xbf16>, vector<64x16xbf16>, vector<24x16xf32> -> vector<24x16xf32>
    %c5_206 = arith.constant 5 : index
    %c0_207 = arith.constant 0 : index
    %c0_208 = arith.constant 0 : index
    %234 = vector.load %arg10[%c5_206, %c0_207, %c0_208] : memref<9x32x24xbf16, #tpu.memory_space<vmem>>, vector<1x32x24xbf16>
    %235 = vector.shape_cast %234 : vector<1x32x24xbf16> to vector<32x24xbf16>
    %236 = arith.truncf %233 : vector<24x16xf32> to vector<24x16xbf16>
    %cst_209 = arith.constant dense<0.000000e+00> : vector<32x16xf32>
    %237 = tpu.matmul %235, %236, %cst_209 {dimension_numbers = #tpu.dot_dimension_numbers<[1], [0], [0], [1], [0, 0, 1, 1], [], []>} : vector<32x24xbf16>, vector<24x16xbf16>, vector<32x16xf32> -> vector<32x16xf32>
    %238 = arith.addf %230, %237 : vector<32x16xf32>
    %c6_210 = arith.constant 6 : index
    %c0_211 = arith.constant 0 : index
    %c0_212 = arith.constant 0 : index
    %239 = vector.load %arg4[%c6_210, %c0_211, %c0_212] : memref<9x64x16xbf16, #tpu.memory_space<vmem>>, vector<1x64x16xbf16>
    %240 = vector.shape_cast %239 : vector<1x64x16xbf16> to vector<64x16xbf16>
    %cst_213 = arith.constant dense<0.000000e+00> : vector<24x16xf32>
    %241 = tpu.matmul %189, %240, %cst_213 {dimension_numbers = #tpu.dot_dimension_numbers<[1], [0], [0], [1], [0, 0, 1, 1], [], []>} : vector<24x64xbf16>, vector<64x16xbf16>, vector<24x16xf32> -> vector<24x16xf32>
    %c6_214 = arith.constant 6 : index
    %c0_215 = arith.constant 0 : index
    %c0_216 = arith.constant 0 : index
    %242 = vector.load %arg10[%c6_214, %c0_215, %c0_216] : memref<9x32x24xbf16, #tpu.memory_space<vmem>>, vector<1x32x24xbf16>
    %243 = vector.shape_cast %242 : vector<1x32x24xbf16> to vector<32x24xbf16>
    %244 = arith.truncf %241 : vector<24x16xf32> to vector<24x16xbf16>
    %cst_217 = arith.constant dense<0.000000e+00> : vector<32x16xf32>
    %245 = tpu.matmul %243, %244, %cst_217 {dimension_numbers = #tpu.dot_dimension_numbers<[1], [0], [0], [1], [0, 0, 1, 1], [], []>} : vector<32x24xbf16>, vector<24x16xbf16>, vector<32x16xf32> -> vector<32x16xf32>
    %246 = arith.addf %238, %245 : vector<32x16xf32>
    %c7_218 = arith.constant 7 : index
    %c0_219 = arith.constant 0 : index
    %c0_220 = arith.constant 0 : index
    %247 = vector.load %arg4[%c7_218, %c0_219, %c0_220] : memref<9x64x16xbf16, #tpu.memory_space<vmem>>, vector<1x64x16xbf16>
    %248 = vector.shape_cast %247 : vector<1x64x16xbf16> to vector<64x16xbf16>
    %cst_221 = arith.constant dense<0.000000e+00> : vector<24x16xf32>
    %249 = tpu.matmul %189, %248, %cst_221 {dimension_numbers = #tpu.dot_dimension_numbers<[1], [0], [0], [1], [0, 0, 1, 1], [], []>} : vector<24x64xbf16>, vector<64x16xbf16>, vector<24x16xf32> -> vector<24x16xf32>
    %c7_222 = arith.constant 7 : index
    %c0_223 = arith.constant 0 : index
    %c0_224 = arith.constant 0 : index
    %250 = vector.load %arg10[%c7_222, %c0_223, %c0_224] : memref<9x32x24xbf16, #tpu.memory_space<vmem>>, vector<1x32x24xbf16>
    %251 = vector.shape_cast %250 : vector<1x32x24xbf16> to vector<32x24xbf16>
    %252 = arith.truncf %249 : vector<24x16xf32> to vector<24x16xbf16>
    %cst_225 = arith.constant dense<0.000000e+00> : vector<32x16xf32>
    %253 = tpu.matmul %251, %252, %cst_225 {dimension_numbers = #tpu.dot_dimension_numbers<[1], [0], [0], [1], [0, 0, 1, 1], [], []>} : vector<32x24xbf16>, vector<24x16xbf16>, vector<32x16xf32> -> vector<32x16xf32>
    %254 = arith.addf %246, %253 : vector<32x16xf32>
    %c8_226 = arith.constant 8 : index
    %c0_227 = arith.constant 0 : index
    %c0_228 = arith.constant 0 : index
    %255 = vector.load %arg4[%c8_226, %c0_227, %c0_228] : memref<9x64x16xbf16, #tpu.memory_space<vmem>>, vector<1x64x16xbf16>
    %256 = vector.shape_cast %255 : vector<1x64x16xbf16> to vector<64x16xbf16>
    %cst_229 = arith.constant dense<0.000000e+00> : vector<24x16xf32>
    %257 = tpu.matmul %189, %256, %cst_229 {dimension_numbers = #tpu.dot_dimension_numbers<[1], [0], [0], [1], [0, 0, 1, 1], [], []>} : vector<24x64xbf16>, vector<64x16xbf16>, vector<24x16xf32> -> vector<24x16xf32>
    %c8_230 = arith.constant 8 : index
    %c0_231 = arith.constant 0 : index
    %c0_232 = arith.constant 0 : index
    %258 = vector.load %arg10[%c8_230, %c0_231, %c0_232] : memref<9x32x24xbf16, #tpu.memory_space<vmem>>, vector<1x32x24xbf16>
    %259 = vector.shape_cast %258 : vector<1x32x24xbf16> to vector<32x24xbf16>
    %260 = arith.truncf %257 : vector<24x16xf32> to vector<24x16xbf16>
    %cst_233 = arith.constant dense<0.000000e+00> : vector<32x16xf32>
    %261 = tpu.matmul %259, %260, %cst_233 {dimension_numbers = #tpu.dot_dimension_numbers<[1], [0], [0], [1], [0, 0, 1, 1], [], []>} : vector<32x24xbf16>, vector<24x16xbf16>, vector<32x16xf32> -> vector<32x16xf32>
    %262 = arith.addf %254, %261 : vector<32x16xf32>
    %c0_234 = arith.constant 0 : index
    %c0_235 = arith.constant 0 : index
    %263 = vector.load %arg11[%c0_234, %c0_235] : memref<32x1xf32, #tpu.memory_space<vmem>>, vector<32x1xf32>
    %264 = vector.broadcast %263 : vector<32x1xf32> to vector<32x16xf32>
    %265 = arith.addf %262, %264 : vector<32x16xf32>
    %cst_236 = arith.constant 0.000000e+00 : f32
    %266 = vector.broadcast %cst_236 : f32 to vector<32x16xf32>
    %267 = arith.subf %266, %265 : vector<32x16xf32>
    %268 = math.exp %267 : vector<32x16xf32>
    %cst_237 = arith.constant 1.000000e+00 : f32
    %269 = vector.broadcast %cst_237 : f32 to vector<32x16xf32>
    %270 = arith.addf %269, %268 : vector<32x16xf32>
    %271 = tpu.reciprocal %270 {approx = true} : vector<32x16xf32> -> vector<32x16xf32>
    %272 = arith.mulf %265, %271 : vector<32x16xf32>
    %273 = arith.truncf %272 : vector<32x16xf32> to vector<32x16xbf16>
    %c0_238 = arith.constant 0 : index
    %c0_239 = arith.constant 0 : index
    %c0_240 = arith.constant 0 : index
    %274 = vector.load %arg16[%c0_238, %c0_239, %c0_240] : memref<1x32x16xbf16, #tpu.memory_space<vmem>>, vector<1x32x16xbf16>
    %275 = vector.shape_cast %274 : vector<1x32x16xbf16> to vector<32x16xbf16>
    %276 = vector.shape_cast %273 : vector<32x16xbf16> to vector<1x32x16xbf16>
    tpu.vector_store %arg16[%c0_238, %c0_239, %c0_240], %276 {strides = array<i32>} : memref<1x32x16xbf16, #tpu.memory_space<vmem>>, vector<1x32x16xbf16>,
    return
  }
  func.func @transform_0(%arg0: i32) -> (i32, i32, i32) {
    %c0_i32 = arith.constant 0 : i32
    %c0_i32_0 = arith.constant 0 : i32
    %c0_i32_1 = arith.constant 0 : i32
    return %arg0, %c0_i32, %c0_i32_0 : i32, i32, i32
  }
  func.func @transform_1(%arg0: i32) -> (i32, i32, i32) {
    %c0_i32 = arith.constant 0 : i32
    %c0_i32_0 = arith.constant 0 : i32
    %c0_i32_1 = arith.constant 0 : i32
    %c0_i32_2 = arith.constant 0 : i32
    return %c0_i32, %c0_i32_0, %c0_i32_1 : i32, i32, i32
  }
  func.func @transform_2(%arg0: i32) -> (i32, i32, i32) {
    %c0_i32 = arith.constant 0 : i32
    %c0_i32_0 = arith.constant 0 : i32
    %c0_i32_1 = arith.constant 0 : i32
    %c0_i32_2 = arith.constant 0 : i32
    return %c0_i32, %c0_i32_0, %c0_i32_1 : i32, i32, i32
  }
  func.func @transform_3(%arg0: i32) -> (i32, i32, i32) {
    %c0_i32 = arith.constant 0 : i32
    %c0_i32_0 = arith.constant 0 : i32
    %c0_i32_1 = arith.constant 0 : i32
    %c0_i32_2 = arith.constant 0 : i32
    return %c0_i32, %c0_i32_0, %c0_i32_1 : i32, i32, i32
  }
  func.func @transform_4(%arg0: i32) -> (i32, i32, i32) {
    %c0_i32 = arith.constant 0 : i32
    %c0_i32_0 = arith.constant 0 : i32
    %c0_i32_1 = arith.constant 0 : i32
    %c0_i32_2 = arith.constant 0 : i32
    return %c0_i32, %c0_i32_0, %c0_i32_1 : i32, i32, i32
  }
  func.func @transform_5(%arg0: i32) -> (i32, i32) {
    %c0_i32 = arith.constant 0 : i32
    %c0_i32_0 = arith.constant 0 : i32
    %c0_i32_1 = arith.constant 0 : i32
    return %c0_i32, %c0_i32_0 : i32, i32
  }
  func.func @transform_6(%arg0: i32) -> (i32, i32) {
    %c0_i32 = arith.constant 0 : i32
    %c0_i32_0 = arith.constant 0 : i32
    %c0_i32_1 = arith.constant 0 : i32
    return %c0_i32, %c0_i32_0 : i32, i32
  }
  func.func @transform_7(%arg0: i32) -> (i32, i32, i32) {
    %c0_i32 = arith.constant 0 : i32
    %c0_i32_0 = arith.constant 0 : i32
    %c0_i32_1 = arith.constant 0 : i32
    %c0_i32_2 = arith.constant 0 : i32
    return %c0_i32, %c0_i32_0, %c0_i32_1 : i32, i32, i32
  }
  func.func @transform_8(%arg0: i32) -> (i32, i32) {
    %c0_i32 = arith.constant 0 : i32
    %c0_i32_0 = arith.constant 0 : i32
    %c0_i32_1 = arith.constant 0 : i32
    return %c0_i32, %c0_i32_0 : i32, i32
  }
  func.func @transform_9(%arg0: i32) -> (i32, i32, i32) {
    %c0_i32 = arith.constant 0 : i32
    %c0_i32_0 = arith.constant 0 : i32
    %c0_i32_1 = arith.constant 0 : i32
    %c0_i32_2 = arith.constant 0 : i32
    return %c0_i32, %c0_i32_0, %c0_i32_1 : i32, i32, i32
  }
  func.func @transform_10(%arg0: i32) -> (i32, i32) {
    %c0_i32 = arith.constant 0 : i32
    %c0_i32_0 = arith.constant 0 : i32
    %c0_i32_1 = arith.constant 0 : i32
    return %c0_i32, %c0_i32_0 : i32, i32
  }
  func.func @transform_11(%arg0: i32) -> (i32, i32, i32) {
    %c0_i32 = arith.constant 0 : i32
    %c0_i32_0 = arith.constant 0 : i32
    %c0_i32_1 = arith.constant 0 : i32
    return %arg0, %c0_i32, %c0_i32_0 : i32, i32, i32
  }
  func.func @transform_12(%arg0: i32) -> (i32, i32, i32) {
    %c0_i32 = arith.constant 0 : i32
    %c0_i32_0 = arith.constant 0 : i32
    %c0_i32_1 = arith.constant 0 : i32
    return %arg0, %c0_i32, %c0_i32_0 : i32, i32, i32
  }
  func.func @transform_13(%arg0: i32) -> (i32, i32, i32) {
    %c0_i32 = arith.constant 0 : i32
    %c0_i32_0 = arith.constant 0 : i32
    %c0_i32_1 = arith.constant 0 : i32
    return %arg0, %c0_i32, %c0_i32_0 : i32, i32, i32
  }
  func.func @transform_14(%arg0: i32) -> (i32, i32, i32) {
    %c0_i32 = arith.constant 0 : i32
    %c0_i32_0 = arith.constant 0 : i32
    %c0_i32_1 = arith.constant 0 : i32
    return %arg0, %c0_i32, %c0_i32_0 : i32, i32, i32
  }
  func.func @transform_15(%arg0: i32) -> (i32, i32, i32) {
    %c0_i32 = arith.constant 0 : i32
    %c0_i32_0 = arith.constant 0 : i32
    %c0_i32_1 = arith.constant 0 : i32
    return %arg0, %c0_i32, %c0_i32_0 : i32, i32, i32
  }
}

</mosaic_0001>

<bundles_post_ra>
// kernel: encoder_forward.1
= control target key start
LH: loop header
LB: loop body
LE: loop exit
PB: predicated region body
PF: predicated region fallthrough
CT: control target
= control target key end

     0   :  { %s7798_s18 = smov 0   ;;  %s8907_s0 = inlined_call_operand.vmem [shape: f32[2,3,256], index: 0, kind: input, shape index: {}]   ;;  %s8908_s1 = inlined_call_operand.vmem [shape: bf16[9,256,64], index: 1, kind: input, shape index: {}]   ;;  %s8909_s2 = inlined_call_operand.vmem [shape: bf16[9,64,64], index: 2, kind: input, shape index: {}]   ;;  %s8910_s3 = inlined_call_operand.vmem [shape: bf16[9,64,16], index: 3, kind: input, shape index: {}]   ;;  %s8911_s4 = inlined_call_operand.vmem [shape: bf16[9,16,3], index: 4, kind: input, shape index: {}]   ;;  %s8912_s5 = inlined_call_operand.vmem [shape: f32[16,1], index: 5, kind: input, shape index: {}]   ;;  %s8913_s6 = inlined_call_operand.vmem [shape: f32[16,1], index: 6, kind: input, shape index: {}]   ;;  %s8914_s7 = inlined_call_operand.vmem [shape: bf16[9,24,16], index: 7, kind: input, shape index: {}]   ;;  %s8915_s8 = inlined_call_operand.vmem [shape: f32[24,1], index: 8, kind: input, shape index: {}]   ;;  %s8916_s9 = inlined_call_operand.vmem [shape: bf16[9,32,24], index: 9, kind: input, shape index: {}]   ;;  %s8917_s10 = inlined_call_operand.vmem [shape: f32[32,1], index: 10, kind: input, shape index: {}]   ;;  %s8918_s11 = inlined_call_operand.vmem [shape: bf16[2,16,64], index: 11, kind: output, shape index: {0}]   ;;  %s8919_s12 = inlined_call_operand.vmem [shape: bf16[2,16,64], index: 12, kind: output, shape index: {1}]   ;;  %s8920_s13 = inlined_call_operand.vmem [shape: bf16[2,16,64], index: 13, kind: output, shape index: {2}]   ;;  %s8921_s14 = inlined_call_operand.vmem [shape: bf16[2,24,64], index: 14, kind: output, shape index: {3}]   ;;  %s8922_s15 = inlined_call_operand.vmem [shape: bf16[2,32,16], index: 15, kind: output, shape index: {4}]  }
   0x1 LB: > { %s5710_s19 = sadd.s32 4294967295, %s7712_s18   ;;  %p5714_p0 = scmp.ge.s32.totalorder %s7712_s18, 1  ;;  %s7712_s18 = sphi %s7798_s18, %s26_s18  }
   0x2   : > { %p446_p1 = scmp.lt.s32.totalorder %s7712_s18, 3 }
   0x4   : > { %p447_p2 = pnand %p5714_p0, %p446_p1 }
   0x5   : > { %v7408_v0 = vld [vmem:[%s8908_s1 + $0xc0] sm:$0xff] (!%p447_p2)   ;;  %v7410_v2 = vld [vmem:[%s8908_s1 + $0xc8] sm:$0xff] (!%p447_p2)   ;;  %p514_p3 = scmp.lt.s32.totalorder (!%p447_p2), %s5710_s19, 1  ;;  %v7412_v4 = vld [vmem:[%s8908_s1 + $0xd0] sm:$0xff] (!%p447_p2)   ;;  %v7714_v26 = vmov (!%p447_p2), 0.0   ;;  %vm7715_vm0 = vmmov (!%p447_p2), 0  }
   0x6   : > { %450 = sbr.rel (%p447_p2) target bundleno = 4733 (0x127d), region = 64  ;;  %v7409_v1 = vld [vmem:[%s8908_s1 + $0x80] sm:$0xff] (!%p447_p2)   ;;  %6570 = vmatprep.subr.bf16.mxu1 (!%p447_p2), %v7408_v0  ;;  %v7411_v3 = vld [vmem:[%s8908_s1 + $0x88] sm:$0xff] (!%p447_p2)   ;;  %v7413_v5 = vld [vmem:[%s8908_s1 + $0x90] sm:$0xff] (!%p447_p2)   ;;  %vm904_vm1 = vcmask (!%p447_p2), 1040384   ;;  %vm905_vm2 = vcmask (!%p447_p2), 1041408  }
   0x7   : > { %6571 = vmatpush3.bf16.msra.mxu1 (!%p447_p2), %v7409_v1  ;;  %v7414_v6 = vld [vmem:[%s8908_s1 + $0xd8] sm:$0xff] (!%p447_p2)   ;;  %v7416_v8 = vld [vmem:[%s8908_s1 + $0xe0] sm:$0xff] (!%p447_p2)   ;;  %v7418_v10 = vld [vmem:[%s8908_s1 + $0xe8] sm:$0xff] (!%p447_p2)   ;;  %v7716_v38 = vmov (!%p447_p2), 65535   ;;  %vm900_vm3 = vcmask (!%p447_p2), 23552   ;;  %vm2601_vm4 = vcmask (!%p447_p2), 519168  }
   0x8   : > { %6572 = vmatprep.subr.bf16.mxu1 (!%p447_p2), %v7410_v2  ;;  %v7415_v7 = vld [vmem:[%s8908_s1 + $0x98] sm:$0xff] (!%p447_p2)   ;;  %v7417_v9 = vld [vmem:[%s8908_s1 + $0xa0] sm:$0xff] (!%p447_p2)   ;;  %v7419_v12 = vld [vmem:[%s8908_s1 + $0xa8] sm:$0xff] (!%p447_p2)   ;;  %v906_v39 = vsel (!%p447_p2), %vm904_vm1, 4294967295, %v7716_v38  ;;  %vm2696_vm5 = vcmask (!%p447_p2), 523264   ;;  %vm2832_vm6 = vcmask (!%p447_p2), 130048  }
   0x9   : > { %v7425_v14 = vld [vmem:[%s8908_s1 + $0x40] sm:$0xff] (!%p447_p2)   ;;  %v7420_v15 = vld [vmem:[%s8908_s1 + $0xf0] sm:$0xff] (!%p447_p2)   ;;  %v7422_v18 = vld [vmem:[%s8908_s1 + $0xf8] sm:$0xff] (!%p447_p2)   ;;  %v7925_v43 = vsel (!%p447_p2), %vm905_vm2, %v906_v39, 0  ;;  %vm4202_vm7 = vcmask (!%p447_p2), 195584   ;;  %vm4209_vm8 = vcmask (!%p447_p2), 1043456  }
   0xa   : > { %6548 = vmatprep.subr.bf16.mxu0 (!%p447_p2), %v7425_v14  ;;  %v7421_v17 = vld [vmem:[%s8908_s1 + $0xb0] sm:$0xff] (!%p447_p2)   ;;  %v7423_v19 = vld [vmem:[%s8908_s1 + $0xb8] sm:$0xff] (!%p447_p2)   ;;  %v7426_v21 = vld [vmem:[%s8908_s1] sm:$0xff] (!%p447_p2)   ;;  %vm5518_vm9 = vcmask (!%p447_p2), 125952  }
   0xb   : > { %6573 = vmatpush3.bf16.msra.mxu1 (!%p447_p2), %v7411_v3  ;;  %6549 = vmatpush3.bf16.msra.mxu0 (!%p447_p2), %v7426_v21  ;;  %v7427_v22 = vld [vmem:[%s8908_s1 + $0x48] sm:$0xff] (!%p447_p2)   ;;  %v7429_v24 = vld [vmem:[%s8908_s1 + $0x50] sm:$0xff] (!%p447_p2)   ;;  %v7433_v27 = vld [vmem:[%s8908_s1 + $0x58] sm:$0xff] (!%p447_p2)  }
   0xc   : > { %6574 = vmatprep.subr.bf16.mxu1 (!%p447_p2), %v7412_v4  ;;  %v7428_v23 = vld [vmem:[%s8908_s1 + $0x8] sm:$0xff] (!%p447_p2)   ;;  %6550 = vmatprep.subr.bf16.mxu0 (!%p447_p2), %v7427_v22  ;;  %v7430_v25 = vld [vmem:[%s8908_s1 + $0x10] sm:$0xff] (!%p447_p2)   ;;  %v7435_v28 = vld [vmem:[%s8908_s1 + $0x18] sm:$0xff] (!%p447_p2)  }
   0xd   : > { %s8924_s19 = smov (!%p514_p3, %s5710_s19), 1  ;;  %v7437_v29 = vld [vmem:[%s8908_s1 + $0x60] sm:$0xff]   ;;  %v7441_v31 = vld [vmem:[%s8908_s1 + $0x68] sm:$0xff]   ;;  %v7445_v33 = vld [vmem:[%s8908_s1 + $0x70] sm:$0xff]  }
   0xe   : > { %s7830_s21 = sshll.u32 %s8924_s19, 3  ;;  %v7439_v30 = vld [vmem:[%s8908_s1 + $0x20] sm:$0xff]   ;;  %v7443_v32 = vld [vmem:[%s8908_s1 + $0x28] sm:$0xff]   ;;  %v7447_v34 = vld [vmem:[%s8908_s1 + $0x30] sm:$0xff]   ;;  %s7393_s20 = smul.u32 12, %s8924_s19 }
   0xf   : > { %6575 = vmatpush3.bf16.msra.mxu1 %v7413_v5  ;;  %s518_s28 = scalar_lea.vmem %s8907_s0, %s7830_s21  ;;  %6551 = vmatpush3.bf16.msra.mxu0 %v7428_v23  ;;  %v7449_v35 = vld [vmem:[%s8908_s1 + $0x78] sm:$0xff]   ;;  %v7432_v46 = vld [vmem:[%s8908_s1 + $0x140] sm:$0xff]   ;;  %v7431_v48 = vld [vmem:[%s8911_s4 + $0x8] sm:$0xff]   ;;  %s523_s25 = scalar_lea.vmem %s8918_s11, %s7830_s21 }
  0x10   : > { %6576 = vmatprep.subr.bf16.mxu1 %v7414_v6  ;;  %v545_v11 = vld [vmem:[%s518_s28] sm:$0x77]  ;;  %6552 = vmatprep.subr.bf16.mxu0 %v7429_v24  ;;  %v7451_v36 = vld [vmem:[%s8908_s1 + $0x38] sm:$0xff]   ;;  %v7436_v50 = vld [vmem:[%s8908_s1 + $0x148] sm:$0xff]   ;;  %s528_s28 = scalar_lea.vmem %s8919_s12, %s7830_s21  ;;  %s533_s16 = scalar_lea.vmem %s8920_s13, %s7830_s21 }
  0x11   : > { %v547_v13 = vcombine.high %v545_v11, %v545_v11  ;;  %v7870_v20 = vpack.c.bf16 %v545_v11, %v545_v11  ;;  %v7434_v49 = vld [vmem:[%s8908_s1 + $0x100] sm:$0xff]   ;;  %v7438_v51 = vld [vmem:[%s8908_s1 + $0x108] sm:$0xff]   ;;  %v7440_v52 = vld [vmem:[%s8908_s1 + $0x150] sm:$0xff]   ;;  %s538_s23 = scalar_lea.vmem %s8921_s14, %s7393_s20 }
  0x12   : > { %v7442_v53 = vld [vmem:[%s8908_s1 + $0x110] sm:$0xff]   ;;  %v7444_v54 = vld [vmem:[%s8908_s1 + $0x158] sm:$0xff]   ;;  %v7448_v56 = vld [vmem:[%s8908_s1 + $0x160] sm:$0xff]  }
  0x13   : > { %6577 = vmatpush3.bf16.msra.mxu1 %v7415_v7  ;;  %v7857_v16 = vpack.c.bf16 %v547_v13, %v547_v13  ;;  %6553 = vmatpush3.bf16.msra.mxu0 %v7430_v25  ;;  %v7446_v55 = vld [vmem:[%s8908_s1 + $0x118] sm:$0xff]   ;;  %v7450_v57 = vld [vmem:[%s8908_s1 + $0x120] sm:$0xff]   ;;  %v7452_v58 = vld [vmem:[%s8908_s1 + $0x168] sm:$0xff]  }
  0x14   : > { %6578 = vmatprep.subr.bf16.mxu1 %v7416_v8  ;;  %6554 = vmatprep.subr.bf16.mxu0 %v7433_v27  ;;  %v7453_v59 = vld [vmem:[%s8908_s1 + $0x128] sm:$0xff]   ;;  %v7454_v60 = vld [vmem:[%s8908_s1 + $0x170] sm:$0xff]   ;;  %v7456_v62 = vld [vmem:[%s8908_s1 + $0x178] sm:$0xff]  }
  0x15   : > { %883 = vmatprep.mubr.bf16.mxu1 %v7857_v16  ;;  %711 = vmatprep.mubr.bf16.mxu0 %v7857_v16  ;;  %v7455_v61 = vld [vmem:[%s8908_s1 + $0x130] sm:$0xff]   ;;  %v7457_v63 = vld [vmem:[%s8908_s1 + $0x138] sm:$0xff]   ;;  %v7458_v0 = vld [vmem:[%s8908_s1 + $0x240] sm:$0xff]  }
  0x16   : > { %v7459_v8 = vld [vmem:[%s8911_s4] sm:$0xff]   ;;  %v7462_v11 = vld [vmem:[%s8908_s1 + $0x208] sm:$0xff]   ;;  %v7464_v13 = vld [vmem:[%s8908_s1 + $0x210] sm:$0xff]  }
  0x17   : > { %6579 = vmatpush3.bf16.msra.mxu1 %v7417_v9  ;;  %6555 = vmatpush3.bf16.msra.mxu0 %v7435_v28  ;;  %v7460_v9 = vld [vmem:[%s8908_s1 + $0x200] sm:$0xff]   ;;  %v7466_v14 = vld [vmem:[%s8908_s1 + $0x258] sm:$0xff]   ;;  %v7477_v21 = vld [vmem:[%s8908_s1 + $0x228] sm:$0xff]  }
  0x18   : > { %6580 = vmatprep.subr.bf16.mxu1 %v7418_v10  ;;  %6556 = vmatprep.subr.bf16.mxu0 %v7437_v29  ;;  %v7461_v10 = vld [vmem:[%s8908_s1 + $0x248] sm:$0xff]   ;;  %v7479_v22 = vld [vmem:[%s8908_s1 + $0x270] sm:$0xff]   ;;  %v7483_v24 = vld [vmem:[%s8908_s1 + $0x278] sm:$0xff]  }
  0x19   : > { %v7481_v23 = vld [vmem:[%s8908_s1 + $0x230] sm:$0xff]   ;;  %v7485_v25 = vld [vmem:[%s8908_s1 + $0x238] sm:$0xff]   ;;  %v7487_v27 = vld [vmem:[%s8908_s1 + $0x2c0] sm:$0xff]  }
  0x1a   : > { %v7489_v28 = vld [vmem:[%s8908_s1 + $0x280] sm:$0xff]   ;;  %v7491_v29 = vld [vmem:[%s8908_s1 + $0x2c8] sm:$0xff]   ;;  %v7504_v39 = vld [vmem:[%s8908_s1 + $0x2f0] sm:$0xff]  }
  0x1b   : > { %6581 = vmatpush3.bf16.msra.mxu1 %v7419_v12  ;;  %6557 = vmatpush3.bf16.msra.mxu0 %v7439_v30  ;;  %v7463_v12 = vld [vmem:[%s8908_s1 + $0x250] sm:$0xff]   ;;  %v7493_v30 = vld [vmem:[%s8908_s1 + $0x288] sm:$0xff]  }
  0x1c   : > { %6582 = vmatprep.subr.bf16.mxu1 %v7420_v15  ;;  %6558 = vmatprep.subr.bf16.mxu0 %v7441_v31  ;;  %v7469_v15 = vld [vmem:[%s8908_s1 + $0x218] sm:$0xff]   ;;  %v7495_v31 = vld [vmem:[%s8908_s1 + $0x2d0] sm:$0xff]   ;;  %v7503_v38 = vld [vmem:[%s8908_s1 + $0x2a8] sm:$0xff]  }
  0x1f   : > { %6583 = vmatpush3.bf16.msra.mxu1 %v7421_v17  ;;  %6559 = vmatpush3.bf16.msra.mxu0 %v7443_v32  ;;  %v7471_v17 = vld [vmem:[%s8908_s1 + $0x260] sm:$0xff]   ;;  %v7497_v32 = vld [vmem:[%s8908_s1 + $0x290] sm:$0xff]  }
  0x20   : > { %6584 = vmatprep.subr.bf16.mxu1 %v7422_v18  ;;  %6560 = vmatprep.subr.bf16.mxu0 %v7445_v33  ;;  %v7473_v18 = vld [vmem:[%s8908_s1 + $0x220] sm:$0xff]   ;;  %v7498_v33 = vld [vmem:[%s8908_s1 + $0x2d8] sm:$0xff]  }
  0x23   : > { %6585 = vmatpush3.bf16.msra.mxu1 %v7423_v19  ;;  %6561 = vmatpush3.bf16.msra.mxu0 %v7447_v34  ;;  %v7475_v19 = vld [vmem:[%s8908_s1 + $0x268] sm:$0xff]   ;;  %v7499_v34 = vld [vmem:[%s8908_s1 + $0x298] sm:$0xff]  }
  0x24   : > { %6926 = vmatprep.subr.bf16.mxu1 %v7714_v26  ;;  %6562 = vmatprep.subr.bf16.mxu0 %v7449_v35  ;;  %v7500_v35 = vld [vmem:[%s8908_s1 + $0x2e0] sm:$0xff]  }
  0x26   : > { %884 = vmatmul.mubr.bf16.vlgmr.msra.gmra.mrb[0].mxu1 %v7870_v20 }
  0x27   : > { %6928 = vmatprep.mubr.msk.bf16.mxu1 %vm7715_vm0, %v7714_v26  ;;  %6563 = vmatpush3.bf16.msra.mxu0 %v7451_v36  ;;  %v7501_v36 = vld [vmem:[%s8908_s1 + $0x2a0] sm:$0xff]  }
  0x28   : > { %6932 = vmatprep.subr.bf16.mxu0 %v7714_v26 }
  0x2a   : > { %712 = vmatmul.mubr.bf16.vlgmr.msra.gmra.mrb[0].mxu0 %v7870_v20 }
  0x2b   : > { %6934 = vmatprep.mubr.msk.bf16.mxu0 %vm7715_vm0, %v7714_v26 }
  0xf9   : > { %v6586_v37 = vpop.f32.mrb[0].mxu1 }
  0xfa   : > { %v6587_v40 = vpop.f32.mrb[1].mxu1 }
  0xfb   : > { %v6588_v41 = vadd.f32 %v6587_v40, %v6586_v37  ;;  %v6589_v42 = vpop.f32.mrb[2].mxu1  ;;  %v7502_v37 = vld [vmem:[%s8908_s1 + $0x2e8] sm:$0xff]   ;;  %v7505_v40 = vld [vmem:[%s8908_s1 + $0x2b0] sm:$0xff]  }
  0xfc   : > { %v6590_v44 = vpop.f32.mrb[3].mxu1  ;;  %v7507_v42 = vld [vmem:[%s8908_s1 + $0x2b8] sm:$0xff]  }
  0xfd   : > { %v894_v45 = vpack.c.bf16 %v6588_v41, %v6588_v41  ;;  %v6564_v1 = vpop.f32.mrb[0].mxu0  ;;  %v7506_v41 = vld [vmem:[%s8908_s1 + $0x2f8] sm:$0xff]  }
  0xfe   : > { %v6565_v2 = vpop.f32.mrb[1].mxu0 }
  0xff   : > { %v909_v47 = vand.u32 %v7925_v43, %v894_v45  ;;  %v6566_v3 = vadd.f32 %v6565_v2, %v6564_v1  ;;  %v6567_v4 = vpop.f32.mrb[2].mxu0  ;;  %v7484_v1 = vld [vmem:[%s8908_s1 + $0x1a0] sm:$0xff]   ;;  %v7486_v2 = vld [vmem:[%s8908_s1 + $0x1e8] sm:$0xff]  }
 0x100   : > { %v6568_v5 = vpop.f32.mrb[3].mxu0  ;;  %v7490_v4 = vld [vmem:[%s8908_s1 + $0x1f0] sm:$0xff]  }
 0x101   : > { %6927 = vmatpush3.bf16.msra.mxu1 %v909_v47  ;;  %v721_v6 = vpack.c.bf16 %v6566_v3, %v6566_v3  ;;  %v7488_v3 = vld [vmem:[%s8908_s1 + $0x1a8] sm:$0xff]   ;;  %v7492_v5 = vld [vmem:[%s8908_s1 + $0x1b0] sm:$0xff]  }
 0x102   : > { %6596 = vmatprep.subr.bf16.mxu1 %v7432_v46 }
 0x103   : > { %v961_v7 = vand.u32 %v7925_v43, %v721_v6  ;;  %v7494_v6 = vld [vmem:[%s8908_s1 + $0x1f8] sm:$0xff]  }
 0x104   : > { %6929 = vmatmul.mubr.msk.bf16.vlgmr.msra.gmra.mrb[4].mxu1 %vm900_vm3, %v7431_v48 }
 0x105   : > { %6597 = vmatpush3.bf16.msra.mxu1 %v7434_v49  ;;  %1165 = vmatprep.mubr.bf16.mxu1 %v7857_v16 }
 0x106   : > { %6598 = vmatprep.subr.bf16.mxu1 %v7436_v50  ;;  %6933 = vmatpush3.bf16.msra.mxu0 %v961_v7  ;;  %v7496_v7 = vld [vmem:[%s8908_s1 + $0x1b8] sm:$0xff]  }
 0x107   : > { %6938 = vmatprep.subr.bf16.mxu0 %v7714_v26 }
 0x109   : > { %6599 = vmatpush3.bf16.msra.mxu1 %v7438_v51  ;;  %6935 = vmatmul.mubr.msk.bf16.vlgmr.msra.gmra.mrb[4].mxu0 %vm900_vm3, %v7459_v8 }
 0x10a   : > { %6600 = vmatprep.subr.bf16.mxu1 %v7440_v52  ;;  %6940 = vmatprep.mubr.msk.bf16.mxu0 %vm7715_vm0, %v7714_v26 }
 0x10d   : > { %6601 = vmatpush3.bf16.msra.mxu1 %v7442_v53 }
 0x10e   : > { %6602 = vmatprep.subr.bf16.mxu1 %v7444_v54  ;;  %v7465_v54 = vld [vmem:[%s8908_s1 + $0x1c0] sm:$0xff]  }
 0x111   : > { %6603 = vmatpush3.bf16.msra.mxu1 %v7446_v55 }
 0x112   : > { %6604 = vmatprep.subr.bf16.mxu1 %v7448_v56  ;;  %v7467_v56 = vld [vmem:[%s8911_s4 + $0x10] sm:$0xff]  }
 0x115   : > { %6605 = vmatpush3.bf16.msra.mxu1 %v7450_v57  ;;  %v7468_v57 = vld [vmem:[%s8908_s1 + $0x180] sm:$0xff]  }
 0x116   : > { %6606 = vmatprep.subr.bf16.mxu1 %v7452_v58  ;;  %v7470_v58 = vld [vmem:[%s8908_s1 + $0x1c8] sm:$0xff]  }
 0x119   : > { %6607 = vmatpush3.bf16.msra.mxu1 %v7453_v59  ;;  %v7472_v59 = vld [vmem:[%s8908_s1 + $0x188] sm:$0xff]  }
 0x11a   : > { %6608 = vmatprep.subr.bf16.mxu1 %v7454_v60  ;;  %v7474_v60 = vld [vmem:[%s8908_s1 + $0x1d0] sm:$0xff]  }
 0x11d   : > { %6609 = vmatpush3.bf16.msra.mxu1 %v7455_v61  ;;  %v7476_v61 = vld [vmem:[%s8908_s1 + $0x190] sm:$0xff]  }
 0x11e   : > { %6610 = vmatprep.subr.bf16.mxu1 %v7456_v62  ;;  %v7478_v62 = vld [vmem:[%s8908_s1 + $0x1d8] sm:$0xff]  }
 0x121   : > { %6611 = vmatpush3.bf16.msra.mxu1 %v7457_v63  ;;  %v7480_v63 = vld [vmem:[%s8908_s1 + $0x198] sm:$0xff]  }
 0x122   : > { %6644 = vmatprep.subr.bf16.mxu1 %v7458_v0  ;;  %v7482_v0 = vld [vmem:[%s8908_s1 + $0x1e0] sm:$0xff]  }
 0x124   : > { %1166 = vmatmul.mubr.bf16.vlgmr.msra.gmra.mrb[8].mxu1 %v7870_v20 }
 0x125   : > { %1619 = vmatprep.mubr.bf16.mxu1 %v7857_v16  ;;  %6645 = vmatpush3.bf16.msra.mxu1 %v7460_v9 }
 0x126   : > { %6646 = vmatprep.subr.bf16.mxu1 %v7461_v10 }
 0x129   : > { %6647 = vmatpush3.bf16.msra.mxu1 %v7462_v11 }
 0x12a   : > { %6648 = vmatprep.subr.bf16.mxu1 %v7463_v12 }
 0x12d   : > { %6649 = vmatpush3.bf16.msra.mxu1 %v7464_v13 }
 0x12e   : > { %6650 = vmatprep.subr.bf16.mxu1 %v7466_v14 }
 0x131   : > { %6651 = vmatpush3.bf16.msra.mxu1 %v7469_v15 }
 0x132   : > { %6652 = vmatprep.subr.bf16.mxu1 %v7471_v17 }
 0x135   : > { %6653 = vmatpush3.bf16.msra.mxu1 %v7473_v18 }
 0x136   : > { %6654 = vmatprep.subr.bf16.mxu1 %v7475_v19  ;;  %v7516_v19 = vld [vmem:[%s8908_s1 + $0x3c0] sm:$0xff]  }
 0x139   : > { %6655 = vmatpush3.bf16.msra.mxu1 %v7477_v21  ;;  %v7518_v21 = vld [vmem:[%s8908_s1 + $0x380] sm:$0xff]  }
 0x13a   : > { %6656 = vmatprep.subr.bf16.mxu1 %v7479_v22  ;;  %v7520_v22 = vld [vmem:[%s8908_s1 + $0x3c8] sm:$0xff]  }
 0x13d   : > { %6657 = vmatpush3.bf16.msra.mxu1 %v7481_v23  ;;  %v7522_v23 = vld [vmem:[%s8908_s1 + $0x388] sm:$0xff]  }
 0x13e   : > { %6658 = vmatprep.subr.bf16.mxu1 %v7483_v24  ;;  %v7524_v24 = vld [vmem:[%s8908_s1 + $0x3d0] sm:$0xff]  }
 0x141   : > { %6659 = vmatpush3.bf16.msra.mxu1 %v7485_v25  ;;  %v7526_v25 = vld [vmem:[%s8908_s1 + $0x390] sm:$0xff]  }
 0x142   : > { %6668 = vmatprep.subr.bf16.mxu1 %v7487_v27  ;;  %v7528_v27 = vld [vmem:[%s8908_s1 + $0x3d8] sm:$0xff]  }
 0x144   : > { %1620 = vmatmul.mubr.bf16.vlgmr.msra.gmra.mrb[12].mxu1 %v7870_v20 }
 0x145   : > { %6669 = vmatpush3.bf16.msra.mxu1 %v7489_v28  ;;  %1846 = vmatprep.mubr.bf16.mxu1 %v7857_v16  ;;  %v7530_v28 = vld [vmem:[%s8908_s1 + $0x398] sm:$0xff]  }
 0x146   : > { %6670 = vmatprep.subr.bf16.mxu1 %v7491_v29  ;;  %v7532_v29 = vld [vmem:[%s8908_s1 + $0x3e0] sm:$0xff]  }
 0x149   : > { %6671 = vmatpush3.bf16.msra.mxu1 %v7493_v30  ;;  %v7534_v30 = vld [vmem:[%s8908_s1 + $0x3a0] sm:$0xff]  }
 0x14a   : > { %6672 = vmatprep.subr.bf16.mxu1 %v7495_v31  ;;  %v7536_v31 = vld [vmem:[%s8908_s1 + $0x3e8] sm:$0xff]  }
 0x14d   : > { %6673 = vmatpush3.bf16.msra.mxu1 %v7497_v32  ;;  %v7538_v32 = vld [vmem:[%s8908_s1 + $0x3a8] sm:$0xff]  }
 0x14e   : > { %6674 = vmatprep.subr.bf16.mxu1 %v7498_v33  ;;  %v7539_v33 = vld [vmem:[%s8908_s1 + $0x3f0] sm:$0xff]  }
 0x151   : > { %6675 = vmatpush3.bf16.msra.mxu1 %v7499_v34  ;;  %v7540_v34 = vld [vmem:[%s8908_s1 + $0x3b0] sm:$0xff]  }
 0x152   : > { %6676 = vmatprep.subr.bf16.mxu1 %v7500_v35  ;;  %v7541_v35 = vld [vmem:[%s8908_s1 + $0x3f8] sm:$0xff]  }
 0x155   : > { %6677 = vmatpush3.bf16.msra.mxu1 %v7501_v36  ;;  %v7542_v36 = vld [vmem:[%s8908_s1 + $0x3b8] sm:$0xff]  }
 0x156   : > { %6678 = vmatprep.subr.bf16.mxu1 %v7502_v37 }
 0x159   : > { %6679 = vmatpush3.bf16.msra.mxu1 %v7503_v38 }
 0x15a   : > { %6680 = vmatprep.subr.bf16.mxu1 %v7504_v39 }
 0x15d   : > { %6681 = vmatpush3.bf16.msra.mxu1 %v7505_v40 }
 0x15e   : > { %6682 = vmatprep.subr.bf16.mxu1 %v7506_v41 }
 0x161   : > { %6683 = vmatpush3.bf16.msra.mxu1 %v7507_v42 }
 0x162   : > { %6716 = vmatprep.subr.bf16.mxu1 %v7516_v19 }
 0x164   : > { %1847 = vmatmul.mubr.bf16.vlgmr.msra.gmra.mrb[16].mxu1 %v7870_v20 }
 0x165   : > { %2300 = vmatprep.mubr.bf16.mxu1 %v7857_v16  ;;  %6717 = vmatpush3.bf16.msra.mxu1 %v7518_v21  ;;  %v7543_v21 = vld [vmem:[%s8911_s4 + $0x30] sm:$0xff]  }
 0x166   : > { %6718 = vmatprep.subr.bf16.mxu1 %v7520_v22 }
 0x169   : > { %6719 = vmatpush3.bf16.msra.mxu1 %v7522_v23  ;;  %v7544_v23 = vld [vmem:[%s8908_s1 + $0x440] sm:$0xff]  }
 0x16a   : > { %6720 = vmatprep.subr.bf16.mxu1 %v7524_v24  ;;  %v7545_v24 = vld [vmem:[%s8911_s4 + $0x38] sm:$0xff]  }
 0x16d   : > { %6721 = vmatpush3.bf16.msra.mxu1 %v7526_v25  ;;  %v7546_v25 = vld [vmem:[%s8908_s1 + $0x400] sm:$0xff]  }
 0x16e   : > { %6722 = vmatprep.subr.bf16.mxu1 %v7528_v27  ;;  %v7547_v27 = vld [vmem:[%s8908_s1 + $0x448] sm:$0xff]  }
 0x171   : > { %6723 = vmatpush3.bf16.msra.mxu1 %v7530_v28  ;;  %v7548_v28 = vld [vmem:[%s8908_s1 + $0x408] sm:$0xff]  }
 0x172   : > { %6724 = vmatprep.subr.bf16.mxu1 %v7532_v29  ;;  %v7549_v29 = vld [vmem:[%s8908_s1 + $0x450] sm:$0xff]  }
 0x175   : > { %6725 = vmatpush3.bf16.msra.mxu1 %v7534_v30  ;;  %v7550_v30 = vld [vmem:[%s8908_s1 + $0x410] sm:$0xff]  }
 0x176   : > { %6726 = vmatprep.subr.bf16.mxu1 %v7536_v31  ;;  %v7551_v31 = vld [vmem:[%s8908_s1 + $0x458] sm:$0xff]  }
 0x179   : > { %6727 = vmatpush3.bf16.msra.mxu1 %v7538_v32  ;;  %v7553_v32 = vld [vmem:[%s8908_s1 + $0x460] sm:$0xff]  }
 0x17a   : > { %6728 = vmatprep.subr.bf16.mxu1 %v7539_v33  ;;  %v7554_v33 = vld [vmem:[%s8908_s1 + $0x420] sm:$0xff]  }
 0x17d   : > { %6729 = vmatpush3.bf16.msra.mxu1 %v7540_v34  ;;  %v7555_v34 = vld [vmem:[%s8908_s1 + $0x468] sm:$0xff]  }
 0x17e   : > { %6730 = vmatprep.subr.bf16.mxu1 %v7541_v35  ;;  %v7556_v35 = vld [vmem:[%s8908_s1 + $0x428] sm:$0xff]  }
 0x181   : > { %6731 = vmatpush3.bf16.msra.mxu1 %v7542_v36  ;;  %v7557_v36 = vld [vmem:[%s8908_s1 + $0x470] sm:$0xff]  }
 0x182   : > { %6980 = vmatprep.subr.bf16.mxu1 %v7714_v26 }
 0x184   : > { %2301 = vmatmul.mubr.bf16.vlgmr.msra.gmra.mrb[20].mxu1 %v7870_v20 }
 0x185   : > { %6988 = vmatprep.mubr.msk.bf16.mxu1 %vm7715_vm0, %v7714_v26 }
 0x1d7   : > { %v8091_v44 = vpop.f32.mrb[4].mxu1 }
 0x1d8   : > { %v6930_v45 = vpop.f32.mrb[5].mxu1 }
 0x1d9   : > { %v8093_v46 = vpop.f32.mrb[6].mxu1 }
 0x1da   : > { %v6931_v47 = vpop.f32.mrb[7].mxu1 }
 0x1f7   : > { %v6612_v48 = vpop.f32.mrb[8].mxu1 }
 0x1f8   : > { %v6613_v49 = vpop.f32.mrb[9].mxu1 }
 0x1f9   : > { %v6614_v50 = vadd.f32 %v6613_v49, %v6612_v48  ;;  %v6615_v51 = vpop.f32.mrb[10].mxu1  ;;  %v7508_v48 = vld [vmem:[%s8911_s4 + $0x18] sm:$0xff]  }
 0x1fa   : > { %v6616_v52 = vpop.f32.mrb[11].mxu1  ;;  %v7509_v51 = vld [vmem:[%s8911_s4 + $0x20] sm:$0xff]  }
 0x1fb   : > { %v1176_v53 = vpack.c.bf16 %v6614_v50, %v6614_v50 }
 0x1fd   : > { %v1186_v55 = vand.u32 %v1176_v53, %v7925_v43  ;;  %v7510_v53 = vld [vmem:[%s8908_s1 + $0x340] sm:$0xff]  }
 0x1ff   : > { %6939 = vmatpush3.bf16.msra.mxu0 %v1186_v55  ;;  %v7512_v55 = vld [vmem:[%s8908_s1 + $0x300] sm:$0xff]  }
 0x200   : > { %6620 = vmatprep.subr.bf16.mxu0 %v7465_v54  ;;  %v7511_v54 = vld [vmem:[%s8911_s4 + $0x28] sm:$0xff]  }
 0x202   : > { %6941 = vmatmul.mubr.msk.bf16.vlgmr.msra.gmra.mrb[4].mxu0 %vm900_vm3, %v7467_v56  ;;  %v7513_v56 = vld [vmem:[%s8908_s1 + $0x348] sm:$0xff]  }
 0x203   : > { %6621 = vmatpush3.bf16.msra.mxu0 %v7468_v57  ;;  %1392 = vmatprep.mubr.bf16.mxu0 %v7857_v16  ;;  %v7514_v57 = vld [vmem:[%s8908_s1 + $0x308] sm:$0xff]  }
 0x204   : > { %6622 = vmatprep.subr.bf16.mxu0 %v7470_v58  ;;  %v7515_v58 = vld [vmem:[%s8908_s1 + $0x350] sm:$0xff]  }
 0x207   : > { %6623 = vmatpush3.bf16.msra.mxu0 %v7472_v59  ;;  %v7517_v59 = vld [vmem:[%s8908_s1 + $0x310] sm:$0xff]  }
 0x208   : > { %6624 = vmatprep.subr.bf16.mxu0 %v7474_v60  ;;  %v7519_v60 = vld [vmem:[%s8908_s1 + $0x358] sm:$0xff]  }
 0x20b   : > { %6625 = vmatpush3.bf16.msra.mxu0 %v7476_v61  ;;  %v7521_v61 = vld [vmem:[%s8908_s1 + $0x318] sm:$0xff]  }
 0x20c   : > { %6626 = vmatprep.subr.bf16.mxu0 %v7478_v62  ;;  %v7523_v62 = vld [vmem:[%s8908_s1 + $0x360] sm:$0xff]  }
 0x20f   : > { %6627 = vmatpush3.bf16.msra.mxu0 %v7480_v63  ;;  %v7525_v63 = vld [vmem:[%s8908_s1 + $0x320] sm:$0xff]  }
 0x210   : > { %6628 = vmatprep.subr.bf16.mxu0 %v7482_v0  ;;  %v7527_v0 = vld [vmem:[%s8908_s1 + $0x368] sm:$0xff]  }
 0x213   : > { %6629 = vmatpush3.bf16.msra.mxu0 %v7484_v1  ;;  %v7529_v1 = vld [vmem:[%s8908_s1 + $0x328] sm:$0xff]  }
 0x214   : > { %6630 = vmatprep.subr.bf16.mxu0 %v7486_v2  ;;  %v7531_v2 = vld [vmem:[%s8908_s1 + $0x370] sm:$0xff]  }
 0x217   : > { %6631 = vmatpush3.bf16.msra.mxu0 %v7488_v3  ;;  %v6660_v8 = vpop.f32.mrb[12].mxu1  ;;  %v7533_v3 = vld [vmem:[%s8908_s1 + $0x330] sm:$0xff]  }
 0x218   : > { %6632 = vmatprep.subr.bf16.mxu0 %v7490_v4  ;;  %v6661_v9 = vpop.f32.mrb[13].mxu1  ;;  %v7535_v4 = vld [vmem:[%s8908_s1 + $0x378] sm:$0xff]  }
 0x219   : > { %v6662_v10 = vadd.f32 %v6661_v9, %v6660_v8  ;;  %v6663_v11 = vpop.f32.mrb[14].mxu1 }
 0x21a   : > { %v6664_v12 = vpop.f32.mrb[15].mxu1 }
 0x21b   : > { %6633 = vmatpush3.bf16.msra.mxu0 %v7492_v5  ;;  %v1630_v45 = vpack.c.bf16 %v6662_v10, %v6662_v10  ;;  %v7537_v5 = vld [vmem:[%s8908_s1 + $0x338] sm:$0xff]  }
 0x21c   : > { %6634 = vmatprep.subr.bf16.mxu0 %v7494_v6 }
 0x21d   : > { %v1640_v49 = vand.u32 %v1630_v45, %v7925_v43  ;;  %v2619_v45 = vld [vmem:[%s8913_s6 + $0x8] sm:$0xff] }
 0x21f   : > { %6635 = vmatpush3.bf16.msra.mxu0 %v7496_v7 }
 0x220   : > { %6944 = vmatprep.subr.bf16.mxu0 %v7714_v26 }
 0x222   : > { %1393 = vmatmul.mubr.bf16.vlgmr.msra.gmra.mrb[8].mxu0 %v7870_v20 }
 0x223   : > { %6946 = vmatprep.mubr.msk.bf16.mxu0 %vm7715_vm0, %v7714_v26 }
 0x237   : > { %v6684_v13 = vpop.f32.mrb[16].mxu1 }
 0x238   : > { %v6685_v14 = vpop.f32.mrb[17].mxu1 }
 0x239   : > { %v6686_v15 = vadd.f32 %v6685_v14, %v6684_v13  ;;  %v6687_v17 = vpop.f32.mrb[18].mxu1 }
 0x23a   : > { %v6688_v18 = vpop.f32.mrb[19].mxu1 }
 0x23b   : > { %v1857_v50 = vpack.c.bf16 %v6686_v15, %v6686_v15 }
 0x23d   : > { %v1867_v52 = vand.u32 %v1857_v50, %v7925_v43  ;;  %v5450_v50 = vld [vmem:[%s8917_s10] sm:$0xff] }
 0x257   : > { %v6732_v6 = vpop.f32.mrb[20].mxu1 }
 0x258   : > { %v6733_v7 = vpop.f32.mrb[21].mxu1 }
 0x259   : > { %v6734_v8 = vadd.f32 %v6733_v7, %v6732_v6  ;;  %v6735_v9 = vpop.f32.mrb[22].mxu1 }
 0x25a   : > { %v6736_v10 = vpop.f32.mrb[23].mxu1 }
 0x25b   : > { %v2311_v18 = vpack.c.bf16 %v6734_v8, %v6734_v8 }
 0x25d   : > { %v2321_v22 = vand.u32 %v2311_v18, %v7925_v43 }
 0x2f5   : > { %v6636_v37 = vpop.f32.mrb[8].mxu0 }
 0x2f6   : > { %v6637_v38 = vpop.f32.mrb[9].mxu0 }
 0x2f7   : > { %v6638_v39 = vadd.f32 %v6637_v38, %v6636_v37  ;;  %v6639_v40 = vpop.f32.mrb[10].mxu0  ;;  %v7558_v37 = vld [vmem:[%s8908_s1 + $0x430] sm:$0xff]   ;;  %v7559_v38 = vld [vmem:[%s8908_s1 + $0x478] sm:$0xff]  }
 0x2f8   : > { %v6640_v41 = vpop.f32.mrb[11].mxu0  ;;  %v2604_v40 = vld [vmem:[%s8912_s5] sm:$0xff] }
 0x2f9   : > { %v1403_v42 = vpack.c.bf16 %v6638_v39, %v6638_v39  ;;  %v7560_v39 = vld [vmem:[%s8908_s1 + $0x438] sm:$0xff]   ;;  %v2618_v41 = vld [vmem:[%s8913_s6] sm:$0xff] }
 0x2fb   : > { %v1413_v47 = vand.u32 %v1403_v42, %v7925_v43  ;;  %v7717_v42 = vmov 0  }
 0x2fc   : > { %7406 = vset.pattern.permute.xlu0 %v7717_v42  ;;  %7407 = vset.pattern.permute.xlu1 %v7717_v42 }
 0x2fd   : > { %6945 = vmatpush3.bf16.msra.mxu0 %v1413_v47  ;;  %2608 = vperm.xlu0 %7406, %v2604_v40   ;;  %v3957_v47 = vld [vmem:[%s8915_s8] sm:$0xff] }
 0x2fe   : > { %6950 = vmatprep.subr.bf16.mxu0 %v7714_v26  ;;  %2622 = vperm.xlu1 %7407, %v2618_v41  }
 0x300   : > { %6947 = vmatmul.mubr.msk.bf16.vlgmr.msra.gmra.mrb[4].mxu0 %vm900_vm3, %v7508_v48  ;;  %v3958_v48 = vld [vmem:[%s8915_s8 + $0x8] sm:$0xff] }
 0x301   : > { %6951 = vmatpush3.bf16.msra.mxu0 %v1640_v49  ;;  %6952 = vmatprep.mubr.msk.bf16.mxu0 %vm7715_vm0, %v7714_v26  ;;  %v3959_v49 = vld [vmem:[%s8915_s8 + $0x10] sm:$0xff] }
 0x302   : > { %6956 = vmatprep.subr.bf16.mxu0 %v7714_v26  ;;  %2627 = vperm.xlu1 %7407, %v2619_v45  }
 0x306   : > { %3967 = vperm.xlu1 %7407, %v3958_v48  }
 0x30a   : > { %5456 = vperm.xlu1 %7407, %v5450_v50  }
 0x30c   : > { %6953 = vmatmul.mubr.msk.bf16.vlgmr.msra.gmra.mrb[4].mxu0 %vm900_vm3, %v7509_v51  ;;  %v5451_v51 = vld [vmem:[%s8917_s10 + $0x8] sm:$0xff] }
 0x30d   : > { %6957 = vmatpush3.bf16.msra.mxu0 %v1867_v52  ;;  %6958 = vmatprep.mubr.msk.bf16.mxu0 %vm7715_vm0, %v7714_v26  ;;  %v5452_v52 = vld [vmem:[%s8917_s10 + $0x10] sm:$0xff] }
 0x30e   : > { %6692 = vmatprep.subr.bf16.mxu0 %v7510_v53  ;;  %5466 = vperm.xlu1 %7407, %v5452_v52   ;;  %v5453_v53 = vld [vmem:[%s8917_s10 + $0x18] sm:$0xff] }
 0x318   : > { %6959 = vmatmul.mubr.msk.bf16.vlgmr.msra.gmra.mrb[4].mxu0 %vm900_vm3, %v7511_v54 }
 0x319   : > { %6693 = vmatpush3.bf16.msra.mxu0 %v7512_v55  ;;  %2073 = vmatprep.mubr.bf16.mxu0 %v7857_v16 }
 0x31a   : > { %6694 = vmatprep.subr.bf16.mxu0 %v7513_v56 }
 0x31d   : > { %6695 = vmatpush3.bf16.msra.mxu0 %v7514_v57 }
 0x31e   : > { %6696 = vmatprep.subr.bf16.mxu0 %v7515_v58 }
 0x321   : > { %6697 = vmatpush3.bf16.msra.mxu0 %v7517_v59 }
 0x322   : > { %6698 = vmatprep.subr.bf16.mxu0 %v7519_v60 }
 0x325   : > { %6699 = vmatpush3.bf16.msra.mxu0 %v7521_v61  ;;  %v7561_v61 = vld [vmem:[%s8911_s4 + $0x40] sm:$0xff]  }
 0x326   : > { %6700 = vmatprep.subr.bf16.mxu0 %v7523_v62  ;;  %v7562_v62 = vld [vmem:[%s8909_s2] sm:$0xff]  }
 0x327   : > { %6981 = vmatpush3.bf16.msra.mxu1 %v7562_v62 }
 0x328   : > { %6982 = vmatprep.subr.bf16.mxu1 %v7714_v26 }
 0x329   : > { %6701 = vmatpush3.bf16.msra.mxu0 %v7525_v63  ;;  %v7563_v63 = vld [vmem:[%s8909_s2 + $0x8] sm:$0xff]  }
 0x32a   : > { %6702 = vmatprep.subr.bf16.mxu0 %v7527_v0  ;;  %v7565_v0 = vld [vmem:[%s8909_s2 + $0x18] sm:$0xff]  }
 0x32b   : > { %6983 = vmatpush3.bf16.msra.mxu1 %v7563_v63 }
 0x32c   : > { %6984 = vmatprep.subr.bf16.mxu1 %v7714_v26 }
 0x32d   : > { %6703 = vmatpush3.bf16.msra.mxu0 %v7529_v1 }
 0x32e   : > { %6704 = vmatprep.subr.bf16.mxu0 %v7531_v2 }
 0x331   : > { %6705 = vmatpush3.bf16.msra.mxu0 %v7533_v3 }
 0x332   : > { %6706 = vmatprep.subr.bf16.mxu0 %v7535_v4 }
 0x335   : > { %6707 = vmatpush3.bf16.msra.mxu0 %v7537_v5 }
 0x336   : > { %6962 = vmatprep.subr.bf16.mxu0 %v7714_v26 }
 0x338   : > { %2074 = vmatmul.mubr.bf16.vlgmr.msra.gmra.mrb[12].mxu0 %v7870_v20 }
 0x339   : > { %6964 = vmatprep.mubr.msk.bf16.mxu0 %vm7715_vm0, %v7714_v26 }
 0x37c   : > { %v2609_v1 = vpop.permute.xlu0 %2608 }
 0x37d   : > { %v2623_v2 = vpop.permute.xlu1 %2622 }
 0x40b   : > { %v6708_v11 = vpop.f32.mrb[12].mxu0 }
 0x40c   : > { %v6709_v12 = vpop.f32.mrb[13].mxu0 }
 0x40d   : > { %v6710_v13 = vadd.f32 %v6709_v12, %v6708_v11  ;;  %v6711_v14 = vpop.f32.mrb[14].mxu0 }
 0x40e   : > { %v6712_v15 = vpop.f32.mrb[15].mxu0 }
 0x40f   : > { %v2084_v17 = vpack.c.bf16 %v6710_v13, %v6710_v13  ;;  %v2628_v15 = vpop.permute.xlu1 %2627 }
 0x411   : > { %v2094_v19 = vand.u32 %v2084_v17, %v7925_v43 }
 0x413   : > { %6963 = vmatpush3.bf16.msra.mxu0 %v2094_v19 }
 0x414   : > { %6968 = vmatprep.subr.bf16.mxu0 %v7714_v26 }
 0x416   : > { %6965 = vmatmul.mubr.msk.bf16.vlgmr.msra.gmra.mrb[4].mxu0 %vm900_vm3, %v7543_v21 }
 0x417   : > { %6969 = vmatpush3.bf16.msra.mxu0 %v2321_v22  ;;  %6970 = vmatprep.mubr.msk.bf16.mxu0 %vm7715_vm0, %v7714_v26 }
 0x418   : > { %6740 = vmatprep.subr.bf16.mxu0 %v7544_v23 }
 0x422   : > { %6971 = vmatmul.mubr.msk.bf16.vlgmr.msra.gmra.mrb[4].mxu0 %vm900_vm3, %v7545_v24 }
 0x423   : > { %6741 = vmatpush3.bf16.msra.mxu0 %v7546_v25  ;;  %2527 = vmatprep.mubr.bf16.mxu0 %v7857_v16  ;;  %v7552_v16 = vld [vmem:[%s8908_s1 + $0x418] sm:$0xff]  }
 0x424   : > { %6742 = vmatprep.subr.bf16.mxu0 %v7547_v27 }
 0x427   : > { %6743 = vmatpush3.bf16.msra.mxu0 %v7548_v28 }
 0x428   : > { %6744 = vmatprep.subr.bf16.mxu0 %v7549_v29 }
 0x42b   : > { %6745 = vmatpush3.bf16.msra.mxu0 %v7550_v30 }
 0x42c   : > { %6746 = vmatprep.subr.bf16.mxu0 %v7551_v31 }
 0x42f   : > { %6747 = vmatpush3.bf16.msra.mxu0 %v7552_v16 }
 0x430   : > { %6748 = vmatprep.subr.bf16.mxu0 %v7553_v32  ;;  %v7566_v32 = vld [vmem:[%s8909_s2 + $0x20] sm:$0xff]  }
 0x433   : > { %6749 = vmatpush3.bf16.msra.mxu0 %v7554_v33 }
 0x434   : > { %6750 = vmatprep.subr.bf16.mxu0 %v7555_v34 }
 0x437   : > { %6751 = vmatpush3.bf16.msra.mxu0 %v7556_v35  ;;  %v7567_v35 = vld [vmem:[%s8909_s2 + $0x28] sm:$0xff]  }
 0x438   : > { %6752 = vmatprep.subr.bf16.mxu0 %v7557_v36  ;;  %v7568_v36 = vld [vmem:[%s8909_s2 + $0x30] sm:$0xff]  }
 0x43b   : > { %6753 = vmatpush3.bf16.msra.mxu0 %v7558_v37  ;;  %v7569_v37 = vld [vmem:[%s8909_s2 + $0x38] sm:$0xff]  }
 0x43c   : > { %6754 = vmatprep.subr.bf16.mxu0 %v7559_v38  ;;  %v7570_v38 = vld [vmem:[%s8914_s7 + $0xc] sm:$0xff]  }
 0x43f   : > { %6755 = vmatpush3.bf16.msra.mxu0 %v7560_v39  ;;  %v7571_v39 = vld [vmem:[%s8914_s7] sm:$0xff]  }
 0x440   : > { %6974 = vmatprep.subr.bf16.mxu0 %v7714_v26 }
 0x442   : > { %2528 = vmatmul.mubr.bf16.vlgmr.msra.gmra.mrb[16].mxu0 %v7870_v20  ;;  %v2605_v20 = vld [vmem:[%s8912_s5 + $0x8] sm:$0xff] }
 0x443   : > { %6976 = vmatprep.mubr.msk.bf16.mxu0 %vm7715_vm0, %v7714_v26  ;;  %2613 = vperm.xlu0 %7406, %v2605_v20  }
 0x447   : > { %3962 = vperm.xlu0 %7406, %v3957_v47   ;;  %v7573_v47 = vld [vmem:[%s8914_s7 + $0x8] ss:$0 sps:$4 sm:$0xff]  }
 0x44b   : > { %3972 = vperm.xlu0 %7406, %v3959_v49  }
 0x44f   : > { %5461 = vperm.xlu0 %7406, %v5451_v51  }
 0x453   : > { %5471 = vperm.xlu0 %7406, %v5453_v53   ;;  %v7572_v53 = vld [vmem:[%s8914_s7 + $0x14] ss:$0 sps:$4 sm:$0xff]  }
 0x4c2   : > { %v2614_v11 = vpop.permute.xlu0 %2613 }
 0x515   : > { %v6756_v54 = vpop.f32.mrb[16].mxu0 }
 0x516   : > { %v6757_v55 = vpop.f32.mrb[17].mxu0 }
 0x517   : > { %v6758_v56 = vadd.f32 %v6757_v55, %v6756_v54  ;;  %v6759_v57 = vpop.f32.mrb[18].mxu0  ;;  %v7574_v54 = vld [vmem:[%s8909_s2 + $0x40] sm:$0xff]   ;;  %v7575_v55 = vld [vmem:[%s8909_s2 + $0x48] sm:$0xff]  }
 0x518   : > { %v6760_v58 = vpop.f32.mrb[19].mxu0  ;;  %v7577_v57 = vld [vmem:[%s8909_s2 + $0x58] sm:$0xff]  }
 0x519   : > { %v2538_v59 = vpack.c.bf16 %v6758_v56, %v6758_v56  ;;  %v7576_v56 = vld [vmem:[%s8909_s2 + $0x50] sm:$0xff]   ;;  %v7578_v58 = vld [vmem:[%s8914_s7 + $0x18] sm:$0xff]  }
 0x51b   : > { %v2548_v60 = vand.u32 %v2538_v59, %v7925_v43  ;;  %v7564_v43 = vld [vmem:[%s8909_s2 + $0x10] sm:$0xff]  }
 0x51c   : > { %6985 = vmatpush3.bf16.msra.mxu1 %v7564_v43 }
 0x51d   : > { %6975 = vmatpush3.bf16.msra.mxu0 %v2548_v60  ;;  %6986 = vmatprep.subr.bf16.mxu1 %v7714_v26 }
 0x520   : > { %6977 = vmatmul.mubr.msk.bf16.vlgmr.msra.gmra.mrb[4].mxu0 %vm900_vm3, %v7561_v61  ;;  %6987 = vmatpush3.bf16.msra.mxu1 %v7565_v0 }
 0x521   : > { %6992 = vmatprep.subr.bf16.mxu1 %v7714_v26  ;;  %7012 = vmatprep.mubr.msk.bf16.mxu0 %vm2832_vm6, %v7571_v39 }
 0x5f3   : > { %v2584_v3 = vpop.f32.mrb[4].mxu0 }
 0x5f4   : > { %v7322_v4 = vadd.f32 %v2584_v3, %v8091_v44  ;;  %v6978_v5 = vpop.f32.mrb[5].mxu0 }
 0x5f5   : > { %v2587_v6 = vpop.f32.mrb[6].mxu0 }
 0x5f6   : > { %v6535_v7 = vpack.c.bf16 %v7322_v4, %v7322_v4  ;;  %v2616_v8 = vmul.f32 %v7322_v4, %v2609_v1  ;;  %v7323_v9 = vadd.f32 %v2587_v6, %v8093_v46  ;;  %v6979_v10 = vpop.f32.mrb[7].mxu0 }
 0x5f7   : > { %v7579_v10 = vld [vmem:[%s8914_s7 + $0x20] ss:$0 sps:$4 sm:$0xff]  }
 0x5f8   : > { %2602 = vst.msk [vmem:[%s523_s25] sm:$0xf] %vm2601_vm4, %v6535_v7  ;;  %v2630_v12 = vadd.f32 %v2623_v2, %v2616_v8  ;;  %v6536_v13 = vpack.c.bf16 %v7323_v9, %v7323_v9  ;;  %v2617_v14 = vmul.f32 %v7323_v9, %v2614_v11  ;;  %v7580_v11 = vld [vmem:[%s8909_s2 + $0x60] sm:$0xff]  }
 0x5fa   : > { %v6537_v44 = vpack.c.bf16 %v2630_v12, %v2630_v12  ;;  %v2642_v17 = vsub.f32 0.0, %v2630_v12  ;;  %2603 = vst.msk [vmem:[%s523_s25 + $0x4] sm:$0xf] %vm2601_vm4, %v6536_v13  ;;  %v2631_v18 = vadd.f32 %v2628_v15, %v2617_v14  ;;  %v7582_v13 = vld [vmem:[%s8909_s2 + $0x70] sm:$0xff]   ;;  %v7583_v14 = vld [vmem:[%s8909_s2 + $0x78] sm:$0xff]   ;;  %v7584_v15 = vld [vmem:[%s8914_s7 + $0x24] sm:$0xff]  }
 0x5fc   : > { %2640 = vst.msk [vmem:[%s528_s28] sm:$0xf] %vm2601_vm4, %v6537_v44  ;;  %v2644_v46 = vmul.f32 1.442695, %v2642_v17  ;;  %v6538_v19 = vpack.c.bf16 %v2631_v18, %v2631_v18  ;;  %v2643_v21 = vsub.f32 0.0, %v2631_v18 }
 0x5fe   : > { %7670 = vpow2.f32 %v2644_v46  ;;  %2641 = vst.msk [vmem:[%s528_s28 + $0x4] sm:$0xf] %vm2601_vm4, %v6538_v19  ;;  %v2646_v22 = vmul.f32 1.442695, %v2643_v21 }
 0x600   : > { %7672 = vpow2.f32 %v2646_v22 }
 0x608   : > { %v7671_v23 = vpop.eup %7670 }
 0x609   : > { %v2648_v24 = vadd.f32 1.0, %v7671_v23 }
 0x60a   : > { %v7673_v25 = vpop.eup %7672 }
 0x60b   : > { %7674 = vrcp.f32 %v2648_v24  ;;  %v2649_v27 = vadd.f32 1.0, %v7673_v25 }
 0x60d   : > { %7676 = vrcp.f32 %v2649_v27 }
 0x615   : > { %v7675_v28 = vpop.eup %7674 }
 0x616   : > { %v2652_v29 = vmul.f32 %v7675_v28, %v2630_v12  ;;  %v7581_v12 = vld [vmem:[%s8909_s2 + $0x68] sm:$0xff]  }
 0x617   : > { %v7677_v30 = vpop.eup %7676 }
 0x618   : > { %v6539_v31 = vpack.c.bf16 %v2652_v29, %v2652_v29  ;;  %v2653_v16 = vmul.f32 %v7677_v30, %v2631_v18  ;;  %v7586_v30 = vld [vmem:[%s8909_s2 + $0x80] sm:$0xff]  }
 0x61a   : > { %2662 = vst.msk [vmem:[%s533_s16] sm:$0xf] %vm2601_vm4, %v6539_v31  ;;  %v8421_v33 = vpack.c.bf16 %v2653_v16, %v2652_v29  ;;  %v6540_v34 = vpack.c.bf16 %v2653_v16, %v2653_v16  ;;  %v7585_v29 = vld [vmem:[%s8914_s7 + $0x2c] ss:$0 sps:$4 sm:$0xff]   ;;  %v7588_v16 = vld [vmem:[%s8909_s2 + $0x90] sm:$0xff]  }
 0x61b   : > { %v7587_v31 = vld [vmem:[%s8909_s2 + $0x88] sm:$0xff]  }
 0x61c   : > { %2663 = vst.msk [vmem:[%s533_s16 + $0x4] sm:$0xf] %vm2601_vm4, %v6540_v34  ;;  %6989 = vmatmul.mubr.msk.bf16.vlgmr.msra.gmra.mrb[24].mxu1 %vm2696_vm5, %v8421_v33  ;;  %v7590_v34 = vld [vmem:[%s8914_s7 + $0x30] sm:$0xff]  }
 0x61d   : > { %6993 = vmatpush3.bf16.msra.mxu1 %v7566_v32  ;;  %7000 = vmatprep.mubr.msk.bf16.mxu1 %vm7715_vm0, %v7714_v26  ;;  %v7589_v32 = vld [vmem:[%s8909_s2 + $0x98] sm:$0xff]  }
 0x61e   : > { %6994 = vmatprep.subr.bf16.mxu1 %v7714_v26 }
 0x621   : > { %6995 = vmatpush3.bf16.msra.mxu1 %v7567_v35 }
 0x622   : > { %6996 = vmatprep.subr.bf16.mxu1 %v7714_v26 }
 0x625   : > { %6997 = vmatpush3.bf16.msra.mxu1 %v7568_v36 }
 0x626   : > { %6998 = vmatprep.subr.bf16.mxu1 %v7714_v26 }
 0x629   : > { %6999 = vmatpush3.bf16.msra.mxu1 %v7569_v37 }
 0x62c   : > { %7001 = vmatmul.mubr.msk.bf16.vlgmr.msra.gmra.mrb[28].mxu1 %vm2696_vm5, %v8421_v33 }
 0x62d   : > { %7006 = vmatprep.mubr.msk.bf16.mxu1 %vm2832_vm6, %v7570_v38 }
 0x6ef   : > { %v2734_v40 = vpop.f32.mrb[24].mxu1 }
 0x6f0   : > { %v6990_v41 = vpop.f32.mrb[25].mxu1 }
 0x6f1   : > { %v2737_v42 = vpop.f32.mrb[26].mxu1 }
 0x6f2   : > { %v2744_v20 = vpack.c.bf16 %v2737_v42, %v2734_v40  ;;  %v6991_v45 = vpop.f32.mrb[27].mxu1 }
 0x6f4   : > { %7010 = vmatprep.subr.bf16.mxu0 %v2744_v20 }
 0x6f5   : > { %7011 = vmatpush3.bf16.msra.mxu0 %v2744_v20 }
 0x6f8   : > { %7013 = vmatmul.mubr.msk.bf16.vlgmr.msra.gmra.mrb[20].mxu0 %vm2832_vm6, %v7573_v47 }
 0x6f9   : > { %7030 = vmatprep.mubr.msk.bf16.mxu0 %vm2832_vm6, %v7578_v58 }
 0x6ff   : > { %v2812_v48 = vpop.f32.mrb[28].mxu1 }
 0x700   : > { %v7002_v49 = vpop.f32.mrb[29].mxu1 }
 0x701   : > { %v2815_v50 = vpop.f32.mrb[30].mxu1  ;;  %v7591_v49 = vld [vmem:[%s8914_s7 + $0x38] ss:$0 sps:$4 sm:$0xff]  }
 0x702   : > { %v2823_v51 = vpack.c.bf16 %v2815_v50, %v2812_v48  ;;  %v7003_v52 = vpop.f32.mrb[31].mxu1  ;;  %v7592_v50 = vld [vmem:[%s8909_s2 + $0xa0] sm:$0xff]  }
 0x703   : > { %v7594_v52 = vld [vmem:[%s8909_s2 + $0xb0] sm:$0xff]  }
 0x704   : > { %7004 = vmatprep.subr.bf16.mxu1 %v2823_v51 }
 0x705   : > { %7005 = vmatpush3.bf16.msra.mxu1 %v2823_v51  ;;  %v7593_v51 = vld [vmem:[%s8909_s2 + $0xa8] sm:$0xff]  }
 0x706   : > { %7016 = vmatprep.subr.bf16.mxu1 %v7714_v26 }
 0x708   : > { %7007 = vmatmul.mubr.msk.bf16.vlgmr.msra.gmra.mrb[32].mxu1 %vm2832_vm6, %v7572_v53  ;;  %v7595_v53 = vld [vmem:[%s8909_s2 + $0xb8] sm:$0xff]  }
 0x709   : > { %7017 = vmatpush3.bf16.msra.mxu1 %v7574_v54  ;;  %7024 = vmatprep.mubr.msk.bf16.mxu1 %vm7715_vm0, %v7714_v26  ;;  %v7596_v54 = vld [vmem:[%s8914_s7 + $0x3c] sm:$0xff]  }
 0x70a   : > { %7018 = vmatprep.subr.bf16.mxu1 %v7714_v26 }
 0x70d   : > { %7019 = vmatpush3.bf16.msra.mxu1 %v7575_v55 }
 0x70e   : > { %7020 = vmatprep.subr.bf16.mxu1 %v7714_v26 }
 0x711   : > { %7021 = vmatpush3.bf16.msra.mxu1 %v7576_v56 }
 0x712   : > { %7022 = vmatprep.subr.bf16.mxu1 %v7714_v26 }
 0x715   : > { %7023 = vmatpush3.bf16.msra.mxu1 %v7577_v57 }
 0x718   : > { %7025 = vmatmul.mubr.msk.bf16.vlgmr.msra.gmra.mrb[36].mxu1 %vm2696_vm5, %v8421_v33 }
 0x719   : > { %7048 = vmatprep.mubr.msk.bf16.mxu1 %vm2832_vm6, %v7584_v15 }
 0x7cb   : > { %v7014_v59 = vpop.f32.mrb[20].mxu0 }
 0x7cc   : > { %v2935_v60 = vpop.f32.mrb[21].mxu0 }
 0x7cd   : > { %v7015_v61 = vpop.f32.mrb[22].mxu0 }
 0x7ce   : > { %v2938_v62 = vpop.f32.mrb[23].mxu0 }
 0x7db   : > { %v7008_v63 = vpop.f32.mrb[32].mxu1 }
 0x7dc   : > { %v2944_v43 = vadd.f32 %v7014_v59, %v7008_v63  ;;  %v2873_v0 = vpop.f32.mrb[33].mxu1 }
 0x7dd   : > { %v2936_v1 = vadd.f32 %v2935_v60, %v2873_v0  ;;  %v7009_v2 = vpop.f32.mrb[34].mxu1 }
 0x7de   : > { %v2876_v3 = vpop.f32.mrb[35].mxu1  ;;  %v7597_v2 = vld [vmem:[%s8914_s7 + $0x44] ss:$0 sps:$4 sm:$0xff]  }
 0x7df   : > { %v2939_v4 = vadd.f32 %v2938_v62, %v2876_v3  ;;  %v7598_v3 = vld [vmem:[%s8909_s2 + $0xc0] sm:$0xff]  }
 0x7eb   : > { %v3016_v5 = vpop.f32.mrb[36].mxu1 }
 0x7ec   : > { %v7026_v6 = vpop.f32.mrb[37].mxu1 }
 0x7ed   : > { %v3019_v7 = vpop.f32.mrb[38].mxu1  ;;  %v7601_v6 = vld [vmem:[%s8909_s2 + $0xd8] sm:$0xff]  }
 0x7ee   : > { %v3027_v8 = vpack.c.bf16 %v3019_v7, %v3016_v5  ;;  %v7027_v9 = vpop.f32.mrb[39].mxu1  ;;  %v7600_v5 = vld [vmem:[%s8909_s2 + $0xd0] sm:$0xff]   ;;  %v7602_v7 = vld [vmem:[%s8914_s7 + $0x48] sm:$0xff]  }
 0x7f0   : > { %7028 = vmatprep.subr.bf16.mxu0 %v3027_v8 }
 0x7f1   : > { %7029 = vmatpush3.bf16.msra.mxu0 %v3027_v8 }
 0x7f2   : > { %7034 = vmatprep.subr.bf16.mxu0 %v7714_v26 }
 0x7f4   : > { %7031 = vmatmul.mubr.msk.bf16.vlgmr.msra.gmra.mrb[24].mxu0 %vm2832_vm6, %v7579_v10 }
 0x7f5   : > { %7035 = vmatpush3.bf16.msra.mxu0 %v7580_v11  ;;  %7042 = vmatprep.mubr.msk.bf16.mxu0 %vm7715_vm0, %v7714_v26 }
 0x7f6   : > { %7036 = vmatprep.subr.bf16.mxu0 %v7714_v26 }
 0x7f9   : > { %7037 = vmatpush3.bf16.msra.mxu0 %v7581_v12 }
 0x7fa   : > { %7038 = vmatprep.subr.bf16.mxu0 %v7714_v26 }
 0x7fd   : > { %7039 = vmatpush3.bf16.msra.mxu0 %v7582_v13 }
 0x7fe   : > { %7040 = vmatprep.subr.bf16.mxu0 %v7714_v26 }
 0x801   : > { %7041 = vmatpush3.bf16.msra.mxu0 %v7583_v14 }
 0x804   : > { %7043 = vmatmul.mubr.msk.bf16.vlgmr.msra.gmra.mrb[28].mxu0 %vm2696_vm5, %v8421_v33 }
 0x805   : > { %7066 = vmatprep.mubr.msk.bf16.mxu0 %vm2832_vm6, %v7590_v34 }
 0x8c7   : > { %v7032_v44 = vpop.f32.mrb[24].mxu0 }
 0x8c8   : > { %v3092_v17 = vadd.f32 %v7032_v44, %v2944_v43  ;;  %v3076_v18 = vpop.f32.mrb[25].mxu0 }
 0x8c9   : > { %v3090_v46 = vadd.f32 %v3076_v18, %v2936_v1  ;;  %v7033_v19 = vpop.f32.mrb[26].mxu0 }
 0x8ca   : > { %v3079_v21 = vpop.f32.mrb[27].mxu0  ;;  %v7603_v19 = vld [vmem:[%s8914_s7 + $0x50] ss:$0 sps:$4 sm:$0xff]  }
 0x8cb   : > { %v3091_v22 = vadd.f32 %v3079_v21, %v2939_v4  ;;  %v7599_v4 = vld [vmem:[%s8909_s2 + $0xc8] sm:$0xff]   ;;  %v7604_v21 = vld [vmem:[%s8909_s2 + $0xe0] sm:$0xff]  }
 0x8d7   : > { %v3160_v23 = vpop.f32.mrb[28].mxu0 }
 0x8d8   : > { %v7044_v24 = vpop.f32.mrb[29].mxu0 }
 0x8d9   : > { %v3163_v25 = vpop.f32.mrb[30].mxu0  ;;  %v7607_v24 = vld [vmem:[%s8909_s2 + $0xf8] sm:$0xff]  }
 0x8da   : > { %v3171_v27 = vpack.c.bf16 %v3163_v25, %v3160_v23  ;;  %v7045_v28 = vpop.f32.mrb[31].mxu0  ;;  %v7606_v23 = vld [vmem:[%s8909_s2 + $0xf0] sm:$0xff]  }
 0x8db   : > { %v7608_v25 = vld [vmem:[%s8914_s7 + $0x54] sm:$0xff]  }
 0x8dc   : > { %7046 = vmatprep.subr.bf16.mxu1 %v3171_v27 }
 0x8dd   : > { %7047 = vmatpush3.bf16.msra.mxu1 %v3171_v27 }
 0x8de   : > { %7052 = vmatprep.subr.bf16.mxu1 %v7714_v26 }
 0x8e0   : > { %7049 = vmatmul.mubr.msk.bf16.vlgmr.msra.gmra.mrb[40].mxu1 %vm2832_vm6, %v7585_v29 }
 0x8e1   : > { %7053 = vmatpush3.bf16.msra.mxu1 %v7586_v30  ;;  %7060 = vmatprep.mubr.msk.bf16.mxu1 %vm7715_vm0, %v7714_v26 }
 0x8e2   : > { %7054 = vmatprep.subr.bf16.mxu1 %v7714_v26 }
 0x8e5   : > { %7055 = vmatpush3.bf16.msra.mxu1 %v7587_v31 }
 0x8e6   : > { %7056 = vmatprep.subr.bf16.mxu1 %v7714_v26 }
 0x8e9   : > { %7057 = vmatpush3.bf16.msra.mxu1 %v7588_v16 }
 0x8ea   : > { %7058 = vmatprep.subr.bf16.mxu1 %v7714_v26 }
 0x8ed   : > { %7059 = vmatpush3.bf16.msra.mxu1 %v7589_v32 }
 0x8f0   : > { %7061 = vmatmul.mubr.msk.bf16.vlgmr.msra.gmra.mrb[44].mxu1 %vm2696_vm5, %v8421_v33 }
 0x8f1   : > { %7084 = vmatprep.mubr.msk.bf16.mxu1 %vm2832_vm6, %v7596_v54 }
 0x9b3   : > { %v7050_v35 = vpop.f32.mrb[40].mxu1 }
 0x9b4   : > { %v3236_v36 = vadd.f32 %v7050_v35, %v3092_v17  ;;  %v3220_v37 = vpop.f32.mrb[41].mxu1 }
 0x9b5   : > { %v3234_v38 = vadd.f32 %v3220_v37, %v3090_v46  ;;  %v7051_v39 = vpop.f32.mrb[42].mxu1 }
 0x9b6   : > { %v3223_v40 = vpop.f32.mrb[43].mxu1  ;;  %v7609_v39 = vld [vmem:[%s8914_s7 + $0x5c] ss:$0 sps:$4 sm:$0xff]  }
 0x9b7   : > { %v3235_v41 = vadd.f32 %v3223_v40, %v3091_v22  ;;  %v7605_v22 = vld [vmem:[%s8909_s2 + $0xe8] sm:$0xff]   ;;  %v7610_v40 = vld [vmem:[%s8909_s2 + $0x100] sm:$0xff]  }
 0x9c3   : > { %v3304_v42 = vpop.f32.mrb[44].mxu1 }
 0x9c4   : > { %v7062_v20 = vpop.f32.mrb[45].mxu1 }
 0x9c5   : > { %v3307_v45 = vpop.f32.mrb[46].mxu1  ;;  %v7613_v20 = vld [vmem:[%s8909_s2 + $0x118] sm:$0xff]  }
 0x9c6   : > { %v3315_v47 = vpack.c.bf16 %v3307_v45, %v3304_v42  ;;  %v7063_v48 = vpop.f32.mrb[47].mxu1  ;;  %v7612_v42 = vld [vmem:[%s8909_s2 + $0x110] sm:$0xff]   ;;  %v7614_v45 = vld [vmem:[%s8914_s7 + $0x60] sm:$0xff]  }
 0x9c8   : > { %7064 = vmatprep.subr.bf16.mxu0 %v3315_v47 }
 0x9c9   : > { %7065 = vmatpush3.bf16.msra.mxu0 %v3315_v47 }
 0x9ca   : > { %7070 = vmatprep.subr.bf16.mxu0 %v7714_v26 }
 0x9cc   : > { %7067 = vmatmul.mubr.msk.bf16.vlgmr.msra.gmra.mrb[32].mxu0 %vm2832_vm6, %v7591_v49 }
 0x9cd   : > { %7071 = vmatpush3.bf16.msra.mxu0 %v7592_v50  ;;  %7078 = vmatprep.mubr.msk.bf16.mxu0 %vm7715_vm0, %v7714_v26 }
 0x9ce   : > { %7072 = vmatprep.subr.bf16.mxu0 %v7714_v26 }
 0x9d1   : > { %7073 = vmatpush3.bf16.msra.mxu0 %v7593_v51 }
 0x9d2   : > { %7074 = vmatprep.subr.bf16.mxu0 %v7714_v26 }
 0x9d5   : > { %7075 = vmatpush3.bf16.msra.mxu0 %v7594_v52 }
 0x9d6   : > { %7076 = vmatprep.subr.bf16.mxu0 %v7714_v26 }
 0x9d9   : > { %7077 = vmatpush3.bf16.msra.mxu0 %v7595_v53 }
 0x9dc   : > { %7079 = vmatmul.mubr.msk.bf16.vlgmr.msra.gmra.mrb[36].mxu0 %vm2696_vm5, %v8421_v33 }
 0x9dd   : > { %7102 = vmatprep.mubr.msk.bf16.mxu0 %vm2832_vm6, %v7602_v7 }
 0xa9f   : > { %v7068_v55 = vpop.f32.mrb[32].mxu0 }
 0xaa0   : > { %v3380_v56 = vadd.f32 %v7068_v55, %v3236_v36  ;;  %v3364_v57 = vpop.f32.mrb[33].mxu0 }
 0xaa1   : > { %v3378_v58 = vadd.f32 %v3364_v57, %v3234_v38  ;;  %v7069_v59 = vpop.f32.mrb[34].mxu0 }
 0xaa2   : > { %v3367_v60 = vpop.f32.mrb[35].mxu0  ;;  %v7617_v59 = vld [vmem:[%s8910_s3] sm:$0xff]  }
 0xaa3   : > { %v3379_v61 = vadd.f32 %v3367_v60, %v3235_v41  ;;  %v7611_v41 = vld [vmem:[%s8909_s2 + $0x108] sm:$0xff]  }
 0xaa4   : > { %v7618_v60 = vld [vmem:[%s8910_s3 + $0x28] sm:$0xff]  }
 0xaaf   : > { %v3448_v62 = vpop.f32.mrb[36].mxu0 }
 0xab0   : > { %v7080_v63 = vpop.f32.mrb[37].mxu0 }
 0xab1   : > { %v3451_v43 = vpop.f32.mrb[38].mxu0  ;;  %v7621_v63 = vld [vmem:[%s8910_s3 + $0x10] sm:$0xff]  }
 0xab2   : > { %v3459_v0 = vpack.c.bf16 %v3451_v43, %v3448_v62  ;;  %v7081_v1 = vpop.f32.mrb[39].mxu0  ;;  %v7620_v62 = vld [vmem:[%s8910_s3 + $0x30] sm:$0xff]   ;;  %v7622_v43 = vld [vmem:[%s8910_s3 + $0x38] sm:$0xff]  }
 0xab3   : > { %v7624_v1 = vld [vmem:[%s8910_s3 + $0x40] sm:$0xff]  }
 0xab4   : > { %7082 = vmatprep.subr.bf16.mxu1 %v3459_v0 }
 0xab5   : > { %7083 = vmatpush3.bf16.msra.mxu1 %v3459_v0  ;;  %v7623_v0 = vld [vmem:[%s8910_s3 + $0x18] sm:$0xff]  }
 0xab6   : > { %7088 = vmatprep.subr.bf16.mxu1 %v7714_v26 }
 0xab8   : > { %7085 = vmatmul.mubr.msk.bf16.vlgmr.msra.gmra.mrb[48].mxu1 %vm2832_vm6, %v7597_v2  ;;  %v3963_v2 = vpop.permute.xlu0 %3962 }
 0xab9   : > { %7089 = vmatpush3.bf16.msra.mxu1 %v7598_v3  ;;  %7096 = vmatprep.mubr.msk.bf16.mxu1 %vm7715_vm0, %v7714_v26 }
 0xaba   : > { %7090 = vmatprep.subr.bf16.mxu1 %v7714_v26 }
 0xabd   : > { %7091 = vmatpush3.bf16.msra.mxu1 %v7599_v4 }
 0xabe   : > { %7092 = vmatprep.subr.bf16.mxu1 %v7714_v26 }
 0xac1   : > { %7093 = vmatpush3.bf16.msra.mxu1 %v7600_v5 }
 0xac2   : > { %7094 = vmatprep.subr.bf16.mxu1 %v7714_v26 }
 0xac5   : > { %7095 = vmatpush3.bf16.msra.mxu1 %v7601_v6  ;;  %v3973_v6 = vpop.permute.xlu0 %3972 }
 0xac8   : > { %7097 = vmatmul.mubr.msk.bf16.vlgmr.msra.gmra.mrb[52].mxu1 %vm2696_vm5, %v8421_v33 }
 0xac9   : > { %7120 = vmatprep.mubr.msk.bf16.mxu1 %vm2832_vm6, %v7608_v25 }
 0xb8b   : > { %v7086_v8 = vpop.f32.mrb[48].mxu1 }
 0xb8c   : > { %v3524_v9 = vadd.f32 %v7086_v8, %v3380_v56  ;;  %v3508_v10 = vpop.f32.mrb[49].mxu1 }
 0xb8d   : > { %v3522_v11 = vadd.f32 %v3508_v10, %v3378_v58  ;;  %v7087_v12 = vpop.f32.mrb[50].mxu1  ;;  %v7616_v58 = vld [vmem:[%s8910_s3 + $0x20] sm:$0xff]  }
 0xb8e   : > { %v3511_v13 = vpop.f32.mrb[51].mxu1 }
 0xb8f   : > { %v3523_v14 = vadd.f32 %v3511_v13, %v3379_v61  ;;  %v7619_v61 = vld [vmem:[%s8910_s3 + $0x8] sm:$0xff]   ;;  %v3968_v13 = vpop.permute.xlu1 %3967 }
 0xb9b   : > { %v3592_v15 = vpop.f32.mrb[52].mxu1 }
 0xb9c   : > { %v7098_v44 = vpop.f32.mrb[53].mxu1 }
 0xb9d   : > { %v3595_v17 = vpop.f32.mrb[54].mxu1 }
 0xb9e   : > { %v3603_v18 = vpack.c.bf16 %v3595_v17, %v3592_v15  ;;  %v7099_v46 = vpop.f32.mrb[55].mxu1 }
 0xba0   : > { %7100 = vmatprep.subr.bf16.mxu0 %v3603_v18 }
 0xba1   : > { %7101 = vmatpush3.bf16.msra.mxu0 %v3603_v18 }
 0xba2   : > { %7106 = vmatprep.subr.bf16.mxu0 %v7714_v26 }
 0xba4   : > { %7103 = vmatmul.mubr.msk.bf16.vlgmr.msra.gmra.mrb[40].mxu0 %vm2832_vm6, %v7603_v19 }
 0xba5   : > { %7107 = vmatpush3.bf16.msra.mxu0 %v7604_v21  ;;  %7114 = vmatprep.mubr.msk.bf16.mxu0 %vm7715_vm0, %v7714_v26 }
 0xba6   : > { %7108 = vmatprep.subr.bf16.mxu0 %v7714_v26 }
 0xba9   : > { %7109 = vmatpush3.bf16.msra.mxu0 %v7605_v22 }
 0xbaa   : > { %7110 = vmatprep.subr.bf16.mxu0 %v7714_v26 }
 0xbad   : > { %7111 = vmatpush3.bf16.msra.mxu0 %v7606_v23 }
 0xbae   : > { %7112 = vmatprep.subr.bf16.mxu0 %v7714_v26 }
 0xbb1   : > { %7113 = vmatpush3.bf16.msra.mxu0 %v7607_v24 }
 0xbb4   : > { %7115 = vmatmul.mubr.msk.bf16.vlgmr.msra.gmra.mrb[44].mxu0 %vm2696_vm5, %v8421_v33 }
 0xbb5   : > { %7138 = vmatprep.mubr.msk.bf16.mxu0 %vm2832_vm6, %v7614_v45  ;;  %v7631_v45 = vld [vmem:[%s8910_s3 + $0x78] sm:$0xff]  }
 0xc77   : > { %v7104_v27 = vpop.f32.mrb[40].mxu0 }
 0xc78   : > { %v3668_v28 = vadd.f32 %v7104_v27, %v3524_v9  ;;  %v3652_v29 = vpop.f32.mrb[41].mxu0 }
 0xc79   : > { %v3666_v30 = vadd.f32 %v3652_v29, %v3522_v11  ;;  %v7105_v31 = vpop.f32.mrb[42].mxu0 }
 0xc7a   : > { %v3655_v16 = vpop.f32.mrb[43].mxu0 }
 0xc7b   : > { %v3667_v32 = vadd.f32 %v3655_v16, %v3523_v14 }
 0xc87   : > { %v3736_v34 = vpop.f32.mrb[44].mxu0 }
 0xc88   : > { %v7116_v35 = vpop.f32.mrb[45].mxu0 }
 0xc89   : > { %v3739_v36 = vpop.f32.mrb[46].mxu0 }
 0xc8a   : > { %v3747_v37 = vpack.c.bf16 %v3739_v36, %v3736_v34  ;;  %v7117_v38 = vpop.f32.mrb[47].mxu0 }
 0xc8b   : > { %v7625_v38 = vld [vmem:[%s8910_s3 + $0x48] sm:$0xff]  }
 0xc8c   : > { %7118 = vmatprep.subr.bf16.mxu1 %v3747_v37 }
 0xc8d   : > { %7119 = vmatpush3.bf16.msra.mxu1 %v3747_v37 }
 0xc8e   : > { %7124 = vmatprep.subr.bf16.mxu1 %v7714_v26 }
 0xc90   : > { %7121 = vmatmul.mubr.msk.bf16.vlgmr.msra.gmra.mrb[56].mxu1 %vm2832_vm6, %v7609_v39  ;;  %v7626_v39 = vld [vmem:[%s8910_s3 + $0x50] sm:$0xff]  }
 0xc91   : > { %7125 = vmatpush3.bf16.msra.mxu1 %v7610_v40  ;;  %7132 = vmatprep.mubr.msk.bf16.mxu1 %vm7715_vm0, %v7714_v26  ;;  %v7627_v40 = vld [vmem:[%s8910_s3 + $0x58] sm:$0xff]  }
 0xc92   : > { %7126 = vmatprep.subr.bf16.mxu1 %v7714_v26 }
 0xc95   : > { %7127 = vmatpush3.bf16.msra.mxu1 %v7611_v41  ;;  %v7628_v41 = vld [vmem:[%s8910_s3 + $0x60] sm:$0xff]  }
 0xc96   : > { %7128 = vmatprep.subr.bf16.mxu1 %v7714_v26 }
 0xc99   : > { %7129 = vmatpush3.bf16.msra.mxu1 %v7612_v42  ;;  %v7629_v42 = vld [vmem:[%s8910_s3 + $0x68] sm:$0xff]  }
 0xc9a   : > { %7130 = vmatprep.subr.bf16.mxu1 %v7714_v26 }
 0xc9d   : > { %7131 = vmatpush3.bf16.msra.mxu1 %v7613_v20  ;;  %v7630_v20 = vld [vmem:[%s8910_s3 + $0x70] sm:$0xff]  }
 0xc9e   : > { %7154 = vmatprep.subr.bf16.mxu1 %v7616_v58 }
 0xca0   : > { %7133 = vmatmul.mubr.msk.bf16.vlgmr.msra.gmra.mrb[60].mxu1 %vm2696_vm5, %v8421_v33  ;;  %v7615_v33 = vld [vmem:[%s8914_s7 + $0x68] ss:$0 sps:$4 sm:$0xff]  }
 0xca1   : > { %7155 = vmatpush3.bf16.msra.mxu1 %v7616_v58 }
 0xca2   : > { %7156 = vmatprep.subr.bf16.mxu1 %v7618_v60 }
 0xca5   : > { %7157 = vmatpush3.bf16.msra.mxu1 %v7618_v60 }
 0xca6   : > { %7158 = vmatprep.subr.bf16.mxu1 %v7620_v62 }
 0xca9   : > { %7159 = vmatpush3.bf16.msra.mxu1 %v7620_v62 }
 0xcaa   : > { %7160 = vmatprep.subr.bf16.mxu1 %v7622_v43 }
 0xcad   : > { %7161 = vmatpush3.bf16.msra.mxu1 %v7622_v43 }
 0xcae   : > { %7182 = vmatprep.subr.bf16.mxu1 %v7624_v1 }
 0xd63   : > { %v7122_v47 = vpop.f32.mrb[56].mxu1 }
 0xd64   : > { %v3812_v48 = vadd.f32 %v7122_v47, %v3668_v28  ;;  %v3796_v49 = vpop.f32.mrb[57].mxu1  ;;  %v7632_v47 = vld [vmem:[%s8910_s3 + $0xa0] sm:$0xff]  }
 0xd65   : > { %v3810_v50 = vadd.f32 %v3796_v49, %v3666_v30  ;;  %v7123_v51 = vpop.f32.mrb[58].mxu1  ;;  %v7634_v49 = vld [vmem:[%s8910_s3 + $0xb0] sm:$0xff]  }
 0xd66   : > { %v3799_v52 = vpop.f32.mrb[59].mxu1  ;;  %v7636_v51 = vld [vmem:[%s8910_s3 + $0xc0] sm:$0xff]  }
 0xd67   : > { %v3811_v53 = vadd.f32 %v3799_v52, %v3667_v32  ;;  %v7637_v52 = vld [vmem:[%s8910_s3 + $0xc8] sm:$0xff]  }
 0xd73   : > { %v3880_v54 = vpop.f32.mrb[60].mxu1 }
 0xd74   : > { %v7134_v55 = vpop.f32.mrb[61].mxu1 }
 0xd75   : > { %v3883_v26 = vpop.f32.mrb[62].mxu1  ;;  %v7640_v55 = vld [vmem:[%s8910_s3 + $0xe0] sm:$0xff]  }
 0xd76   : > { %v3891_v56 = vpack.c.bf16 %v3883_v26, %v3880_v54  ;;  %v7135_v57 = vpop.f32.mrb[63].mxu1  ;;  %v7639_v54 = vld [vmem:[%s8910_s3 + $0xd8] sm:$0xff]   ;;  %v7641_v26 = vld [vmem:[%s8910_s3 + $0xe8] sm:$0xff]  }
 0xd77   : > { %v7643_v57 = vld [vmem:[%s8910_s3 + $0xf8] sm:$0xff]  }
 0xd78   : > { %7136 = vmatprep.subr.bf16.mxu0 %v3891_v56 }
 0xd79   : > { %7137 = vmatpush3.bf16.msra.mxu0 %v3891_v56  ;;  %v7642_v56 = vld [vmem:[%s8910_s3 + $0xf0] sm:$0xff]  }
 0xd7a   : > { %7142 = vmatprep.subr.bf16.mxu0 %v7617_v59 }
 0xd7c   : > { %7139 = vmatmul.mubr.msk.bf16.vlgmr.msra.gmra.mrb[48].mxu0 %vm2832_vm6, %v7615_v33  ;;  %v7644_v33 = vld [vmem:[%s8916_s9 + $0x10] sm:$0xff]  }
 0xd7d   : > { %7143 = vmatpush3.bf16.msra.mxu0 %v7617_v59 }
 0xd7e   : > { %7144 = vmatprep.subr.bf16.mxu0 %v7619_v61 }
 0xd81   : > { %7145 = vmatpush3.bf16.msra.mxu0 %v7619_v61 }
 0xd82   : > { %7146 = vmatprep.subr.bf16.mxu0 %v7621_v63 }
 0xd85   : > { %7147 = vmatpush3.bf16.msra.mxu0 %v7621_v63 }
 0xd86   : > { %7148 = vmatprep.subr.bf16.mxu0 %v7623_v0 }
 0xd89   : > { %7149 = vmatpush3.bf16.msra.mxu0 %v7623_v0 }
 0xe4f   : > { %v7140_v3 = vpop.f32.mrb[48].mxu0 }
 0xe50   : > { %v3956_v4 = vadd.f32 %v7140_v3, %v3812_v48  ;;  %v3940_v5 = vpop.f32.mrb[49].mxu0  ;;  %v7633_v48 = vld [vmem:[%s8910_s3 + $0xa8] sm:$0xff]  }
 0xe51   : > { %v3954_v7 = vadd.f32 %v3940_v5, %v3810_v50  ;;  %v7141_v8 = vpop.f32.mrb[50].mxu0  ;;  %v7635_v50 = vld [vmem:[%s8910_s3 + $0xb8] sm:$0xff]  }
 0xe52   : > { %v3977_v9 = vadd.f32 %v3973_v6, %v3956_v4  ;;  %v3943_v10 = vpop.f32.mrb[51].mxu0  ;;  %v7645_v5 = vld [vmem:[%s8916_s9 + $0x18] sm:$0xff]   ;;  %v7646_v6 = vld [vmem:[%s8916_s9] sm:$0xff]  }
 0xe53   : > { %v3975_v11 = vadd.f32 %v3963_v2, %v3954_v7  ;;  %v3955_v12 = vadd.f32 %v3943_v10, %v3811_v53  ;;  %v7638_v53 = vld [vmem:[%s8910_s3 + $0xd0] sm:$0xff]  }
 0xe54   : > { %v3980_v14 = vsub.f32 0.0, %v3977_v9 }
 0xe55   : > { %v3978_v15 = vsub.f32 0.0, %v3975_v11  ;;  %v3976_v44 = vadd.f32 %v3968_v13, %v3955_v12 }
 0xe56   : > { %v3985_v17 = vmul.f32 1.442695, %v3980_v14  ;;  %v7647_v14 = vld [vmem:[%s8916_s9 + $0x8] sm:$0xff]  }
 0xe57   : > { %v3981_v18 = vmul.f32 1.442695, %v3978_v15  ;;  %v3979_v46 = vsub.f32 0.0, %v3976_v44  ;;  %v7648_v15 = vld [vmem:[%s8916_s9 + $0x20] sm:$0xff]  }
 0xe58   : > { %7678 = vpow2.f32 %v3985_v17 }
 0xe59   : > { %7680 = vpow2.f32 %v3981_v18  ;;  %v3983_v19 = vmul.f32 1.442695, %v3979_v46 }
 0xe5b   : > { %7682 = vpow2.f32 %v3983_v19 }
 0xe62   : > { %v7679_v21 = vpop.eup %7678 }
 0xe63   : > { %v7681_v22 = vpop.eup %7680  ;;  %v3989_v23 = vadd.f32 1.0, %v7679_v21  ;;  %v7649_v21 = vld [vmem:[%s8916_s9 + $0x28] sm:$0xff]  }
 0xe64   : > { %v3987_v24 = vadd.f32 1.0, %v7681_v22 }
 0xe65   : > { %v7683_v25 = vpop.eup %7682  ;;  %7684 = vrcp.f32 %v3989_v23  ;;  %v7650_v23 = vld [vmem:[%s8916_s9 + $0x30] sm:$0xff]  }
 0xe66   : > { %7686 = vrcp.f32 %v3987_v24  ;;  %v3988_v27 = vadd.f32 1.0, %v7683_v25 }
 0xe68   : > { %7688 = vrcp.f32 %v3988_v27  ;;  %v7651_v27 = vld [vmem:[%s8910_s3 + $0x80] sm:$0xff]  }
 0xe6f   : > { %v7685_v28 = vpop.eup %7684 }
 0xe70   : > { %v7687_v29 = vpop.eup %7686  ;;  %v3995_v30 = vmul.f32 %v7685_v28, %v3977_v9 }
 0xe71   : > { %v3993_v31 = vmul.f32 %v7687_v29, %v3975_v11  ;;  %v7652_v29 = vld [vmem:[%s8916_s9 + $0x38] sm:$0xff]  }
 0xe72   : > { %v7689_v16 = vpop.eup %7688  ;;  %v8685_v32 = vpack.c.bf16 %v3995_v30, %v3995_v30 }
 0xe73   : > { %v6541_v34 = vpack.c.bf16 %v3993_v31, %v3993_v31  ;;  %v3994_v35 = vmul.f32 %v7689_v16, %v3976_v44 }
 0xe74   : > { %4011 = vst.msk [vmem:[%s538_s23 + $0x8] sm:$0xf] %vm2601_vm4, %v8685_v32 }
 0xe75   : > { %4009 = vst.msk [vmem:[%s538_s23] sm:$0xf] %vm2601_vm4, %v6541_v34  ;;  %v8690_v36 = vpack.c.bf16 %v3994_v35, %v3993_v31  ;;  %v6542_v37 = vpack.c.bf16 %v3994_v35, %v3994_v35  ;;  %v7653_v31 = vld [vmem:[%s8910_s3 + $0x88] sm:$0xff]  }
 0xe77   : > { %4010 = vst.msk [vmem:[%s538_s23 + $0x4] sm:$0xf] %vm2601_vm4, %v6542_v37  ;;  %7150 = vmatprep.mubr.msk.bf16.mxu0 %vm2696_vm5, %v8690_v36  ;;  %7162 = vmatprep.mubr.msk.bf16.mxu1 %vm2696_vm5, %v8690_v36  ;;  %s6534_s23 = sshll.u32 %s8924_s19, 4 }
 0xe78   : > { %7151 = vmatmul.mubr.msk.bf16.vlgmr.msra.gmra.mrb[52].mxu0 %vm2696_vm5, %v8685_v32  ;;  %7163 = vmatmul.mubr.msk.bf16.vlgmr.msra.gmra.mrb[64].mxu1 %vm2696_vm5, %v8685_v32  ;;  %s543_s26 = scalar_lea.vmem %s8922_s15, %s6534_s23 }
 0xe79   : > { %7183 = vmatpush3.bf16.msra.mxu1 %v7624_v1  ;;  %7190 = vmatprep.mubr.msk.bf16.mxu1 %vm2696_vm5, %v8690_v36 }
 0xe7a   : > { %7184 = vmatprep.subr.bf16.mxu1 %v7625_v38  ;;  %7170 = vmatprep.mubr.msk.bf16.mxu0 %vm4202_vm7, %v7644_v33 }
 0xe7d   : > { %7185 = vmatpush3.bf16.msra.mxu1 %v7625_v38  ;;  %v7654_v38 = vld [vmem:[%s8910_s3 + $0x90] sm:$0xff]  }
 0xe7e   : > { %7186 = vmatprep.subr.bf16.mxu1 %v7626_v39 }
 0xe81   : > { %7187 = vmatpush3.bf16.msra.mxu1 %v7626_v39  ;;  %v7655_v39 = vld [vmem:[%s8910_s3 + $0x98] sm:$0xff]  }
 0xe82   : > { %7188 = vmatprep.subr.bf16.mxu1 %v7627_v40 }
 0xe85   : > { %7189 = vmatpush3.bf16.msra.mxu1 %v7627_v40 }
 0xe86   : > { %7202 = vmatprep.subr.bf16.mxu1 %v7628_v41 }
 0xe88   : > { %7191 = vmatmul.mubr.msk.bf16.vlgmr.msra.gmra.mrb[68].mxu1 %vm2696_vm5, %v8685_v32 }
 0xe89   : > { %7203 = vmatpush3.bf16.msra.mxu1 %v7628_v41  ;;  %7210 = vmatprep.mubr.msk.bf16.mxu1 %vm2696_vm5, %v8690_v36 }
 0xe8a   : > { %7204 = vmatprep.subr.bf16.mxu1 %v7629_v42 }
 0xe8d   : > { %7205 = vmatpush3.bf16.msra.mxu1 %v7629_v42 }
 0xe8e   : > { %7206 = vmatprep.subr.bf16.mxu1 %v7630_v20 }
 0xe91   : > { %7207 = vmatpush3.bf16.msra.mxu1 %v7630_v20 }
 0xe92   : > { %7208 = vmatprep.subr.bf16.mxu1 %v7631_v45 }
 0xe95   : > { %7209 = vmatpush3.bf16.msra.mxu1 %v7631_v45 }
 0xe96   : > { %7242 = vmatprep.subr.bf16.mxu1 %v7632_v47 }
 0xe98   : > { %7211 = vmatmul.mubr.msk.bf16.vlgmr.msra.gmra.mrb[72].mxu1 %vm2696_vm5, %v8685_v32 }
 0xe99   : > { %7243 = vmatpush3.bf16.msra.mxu1 %v7632_v47  ;;  %7250 = vmatprep.mubr.msk.bf16.mxu1 %vm2696_vm5, %v8690_v36 }
 0xe9a   : > { %7244 = vmatprep.subr.bf16.mxu1 %v7633_v48 }
 0xe9d   : > { %7245 = vmatpush3.bf16.msra.mxu1 %v7633_v48 }
 0xe9e   : > { %7246 = vmatprep.subr.bf16.mxu1 %v7634_v49 }
 0xea1   : > { %7247 = vmatpush3.bf16.msra.mxu1 %v7634_v49 }
 0xea2   : > { %7248 = vmatprep.subr.bf16.mxu1 %v7635_v50 }
 0xea5   : > { %7249 = vmatpush3.bf16.msra.mxu1 %v7635_v50 }
 0xea6   : > { %7262 = vmatprep.subr.bf16.mxu1 %v7636_v51 }
 0xea8   : > { %7251 = vmatmul.mubr.msk.bf16.vlgmr.msra.gmra.mrb[76].mxu1 %vm2696_vm5, %v8685_v32 }
 0xea9   : > { %7263 = vmatpush3.bf16.msra.mxu1 %v7636_v51  ;;  %7270 = vmatprep.mubr.msk.bf16.mxu1 %vm2696_vm5, %v8690_v36 }
 0xeaa   : > { %7264 = vmatprep.subr.bf16.mxu1 %v7637_v52 }
 0xead   : > { %7265 = vmatpush3.bf16.msra.mxu1 %v7637_v52  ;;  %v7656_v52 = vld [vmem:[%s8916_s9 + $0x40] sm:$0xff]  }
 0xeae   : > { %7266 = vmatprep.subr.bf16.mxu1 %v7638_v53 }
 0xeb1   : > { %7267 = vmatpush3.bf16.msra.mxu1 %v7638_v53 }
 0xeb2   : > { %7268 = vmatprep.subr.bf16.mxu1 %v7639_v54 }
 0xeb5   : > { %7269 = vmatpush3.bf16.msra.mxu1 %v7639_v54 }
 0xeb6   : > { %7282 = vmatprep.subr.bf16.mxu1 %v7640_v55 }
 0xeb8   : > { %7271 = vmatmul.mubr.msk.bf16.vlgmr.msra.gmra.mrb[80].mxu1 %vm2696_vm5, %v8685_v32 }
 0xeb9   : > { %7283 = vmatpush3.bf16.msra.mxu1 %v7640_v55  ;;  %7290 = vmatprep.mubr.msk.bf16.mxu1 %vm2696_vm5, %v8690_v36 }
 0xeba   : > { %7284 = vmatprep.subr.bf16.mxu1 %v7641_v26 }
 0xebd   : > { %7285 = vmatpush3.bf16.msra.mxu1 %v7641_v26 }
 0xebe   : > { %7286 = vmatprep.subr.bf16.mxu1 %v7642_v56 }
 0xec1   : > { %7287 = vmatpush3.bf16.msra.mxu1 %v7642_v56 }
 0xec2   : > { %7288 = vmatprep.subr.bf16.mxu1 %v7643_v57 }
 0xec5   : > { %7289 = vmatpush3.bf16.msra.mxu1 %v7643_v57 }
 0xec8   : > { %7291 = vmatmul.mubr.msk.bf16.vlgmr.msra.gmra.mrb[84].mxu1 %vm2696_vm5, %v8685_v32 }
 0xf4b   : > { %v7152_v58 = vpop.f32.mrb[52].mxu0  ;;  %v7164_v59 = vpop.f32.mrb[64].mxu1 }
 0xf4c   : > { %v4084_v60 = vpop.f32.mrb[53].mxu0  ;;  %v4171_v61 = vpop.f32.mrb[65].mxu1  ;;  %v4191_v3 = vpack.c.bf16 %v7164_v59, %v7164_v59  ;;  %v4103_v7 = vpack.c.bf16 %v7152_v58, %v7152_v58  ;;  %v7657_v58 = vld [vmem:[%s8916_s9 + $0x48] sm:$0xff]   ;;  %v7658_v59 = vld [vmem:[%s8916_s9 + $0x50] sm:$0xff]  }
 0xf4d   : > { %v7153_v62 = vpop.f32.mrb[54].mxu0  ;;  %v7165_v63 = vpop.f32.mrb[66].mxu1 }
 0xf4e   : > { %v4087_v43 = vpop.f32.mrb[55].mxu0  ;;  %v4174_v0 = vpop.f32.mrb[67].mxu1  ;;  %v4211_v4 = vsel %vm4209_vm8, %v4191_v3, 0  ;;  %v4279_v10 = vsel %vm4209_vm8, %v4103_v7, 0  ;;  %v7659_v62 = vld [vmem:[%s8916_s9 + $0x58] sm:$0xff]   ;;  %v7660_v63 = vld [vmem:[%s8916_s9 + $0x60] sm:$0xff]  }
 0xf4f   : > { %v4102_v1 = vpack.c.bf16 %v4087_v43, %v4084_v60  ;;  %v4190_v2 = vpack.c.bf16 %v4174_v0, %v4171_v61 }
 0xf51   : > { %7166 = vmatprep.subr.bf16.mxu0 %v4190_v2 }
 0xf52   : > { %7167 = vmatpush3.bf16.msra.mxu0 %v4190_v2  ;;  %v7662_v2 = vld [vmem:[%s8916_s9 + $0x70] sm:$0xff]  }
 0xf53   : > { %7384 = vmatprep.subr.msk.bf16.mxu0 %vm4209_vm8, %v4191_v3 }
 0xf56   : > { %7169 = vmatpush3.bf16.msra.mxu0 %v4211_v4  ;;  %v7663_v4 = vld [vmem:[%s8910_s3 + $0x100] sm:$0xff]  }
 0xf57   : > { %7174 = vmatprep.subr.bf16.mxu0 %v4102_v1 }
 0xf59   : > { %7171 = vmatmul.mubr.msk.bf16.vlgmr.msra.gmra.mrb[56].mxu0 %vm4202_vm7, %v7645_v5 }
 0xf5a   : > { %7175 = vmatpush3.bf16.msra.mxu0 %v4102_v1  ;;  %7178 = vmatprep.mubr.msk.bf16.mxu0 %vm4202_vm7, %v7646_v6  ;;  %v7661_v1 = vld [vmem:[%s8916_s9 + $0x68] sm:$0xff]   ;;  %v7664_v6 = vld [vmem:[%s8916_s9 + $0x78] sm:$0xff]  }
 0xf5b   : > { %v7192_v8 = vpop.f32.mrb[68].mxu1  ;;  %7385 = vmatprep.subr.msk.bf16.mxu0 %vm4209_vm8, %v4103_v7  ;;  %v7665_v7 = vld [vmem:[%s8910_s3 + $0x108] sm:$0xff]  }
 0xf5c   : > { %v4397_v9 = vpop.f32.mrb[69].mxu1  ;;  %v4417_v44 = vpack.c.bf16 %v7192_v8, %v7192_v8  ;;  %v7666_v8 = vld [vmem:[%s8910_s3 + $0x110] sm:$0xff]  }
 0xf5d   : > { %v7193_v11 = vpop.f32.mrb[70].mxu1 }
 0xf5e   : > { %v4400_v12 = vpop.f32.mrb[71].mxu1  ;;  %7177 = vmatpush3.bf16.msra.mxu0 %v4279_v10  ;;  %v4435_v17 = vsel %vm4209_vm8, %v4417_v44, 0 }
 0xf5f   : > { %v4416_v13 = vpack.c.bf16 %v4400_v12, %v4397_v9  ;;  %v7667_v9 = vld [vmem:[%s8910_s3 + $0x118] sm:$0xff]  }
 0xf61   : > { %7194 = vmatprep.subr.bf16.mxu0 %v4416_v13 }
 0xf65   : > { %7179 = vmatmul.mubr.msk.bf16.vlgmr.msra.gmra.mrb[56].mxu0 %vm4202_vm7, %v7647_v14 }
 0xf66   : > { %7195 = vmatpush3.bf16.msra.mxu0 %v4416_v13  ;;  %7198 = vmatprep.mubr.msk.bf16.mxu0 %vm4202_vm7, %v7648_v15 }
 0xf67   : > { %7386 = vmatprep.subr.msk.bf16.mxu0 %vm4209_vm8, %v4417_v44 }
 0xf6a   : > { %7197 = vmatpush3.bf16.msra.mxu0 %v4435_v17  ;;  %v5457_v17 = vpop.permute.xlu1 %5456 }
 0xf6b   : > { %v7212_v18 = vpop.f32.mrb[72].mxu1 }
 0xf6c   : > { %v4557_v46 = vpop.f32.mrb[73].mxu1  ;;  %v4577_v25 = vpack.c.bf16 %v7212_v18, %v7212_v18  ;;  %v5462_v18 = vpop.permute.xlu0 %5461 }
 0xf6d   : > { %v7213_v19 = vpop.f32.mrb[74].mxu1 }
 0xf6e   : > { %v4560_v22 = vpop.f32.mrb[75].mxu1  ;;  %v4595_v28 = vsel %vm4209_vm8, %v4577_v25, 0 }
 0xf6f   : > { %v4576_v24 = vpack.c.bf16 %v4560_v22, %v4557_v46  ;;  %v5467_v46 = vpop.permute.xlu1 %5466 }
 0xf71   : > { %7214 = vmatprep.subr.bf16.mxu0 %v4576_v24  ;;  %7199 = vmatmul.mubr.msk.bf16.vlgmr.msra.gmra.mrb[56].mxu0 %vm4202_vm7, %v7649_v21 }
 0xf72   : > { %7215 = vmatpush3.bf16.msra.mxu0 %v4576_v24  ;;  %7218 = vmatprep.mubr.msk.bf16.mxu0 %vm4202_vm7, %v7650_v23  ;;  %v5472_v23 = vpop.permute.xlu0 %5471 }
 0xf73   : > { %7387 = vmatprep.subr.msk.bf16.mxu0 %vm4209_vm8, %v4577_v25 }
 0xf76   : > { %7217 = vmatpush3.bf16.msra.mxu0 %v4595_v28 }
 0xf77   : > { %7222 = vmatprep.subr.bf16.mxu0 %v7651_v27 }
 0xf7b   : > { %v7252_v30 = vpop.f32.mrb[76].mxu1 }
 0xf7c   : > { %v4877_v16 = vpop.f32.mrb[77].mxu1  ;;  %v4897_v60 = vpack.c.bf16 %v7252_v30, %v7252_v30 }
 0xf7d   : > { %v7253_v34 = vpop.f32.mrb[78].mxu1  ;;  %7219 = vmatmul.mubr.msk.bf16.vlgmr.msra.gmra.mrb[56].mxu0 %vm4202_vm7, %v7652_v29 }
 0xf7e   : > { %7223 = vmatpush3.bf16.msra.mxu0 %v7651_v27  ;;  %v4880_v35 = vpop.f32.mrb[79].mxu1  ;;  %7230 = vmatprep.mubr.msk.bf16.mxu0 %vm2696_vm5, %v8690_v36  ;;  %v4915_v61 = vsel %vm4209_vm8, %v4897_v60, 0 }
 0xf7f   : > { %v4896_v37 = vpack.c.bf16 %v4880_v35, %v4877_v16  ;;  %7224 = vmatprep.subr.bf16.mxu0 %v7653_v31 }
 0xf82   : > { %7225 = vmatpush3.bf16.msra.mxu0 %v7653_v31 }
 0xf83   : > { %7226 = vmatprep.subr.bf16.mxu0 %v7654_v38 }
 0xf86   : > { %7227 = vmatpush3.bf16.msra.mxu0 %v7654_v38 }
 0xf87   : > { %7228 = vmatprep.subr.bf16.mxu0 %v7655_v39 }
 0xf8a   : > { %7229 = vmatpush3.bf16.msra.mxu0 %v7655_v39 }
 0xf8b   : > { %v7272_v40 = vpop.f32.mrb[80].mxu1 }
 0xf8c   : > { %v5037_v41 = vpop.f32.mrb[81].mxu1  ;;  %v5057_v43 = vpack.c.bf16 %v7272_v40, %v7272_v40 }
 0xf8d   : > { %7231 = vmatmul.mubr.msk.bf16.vlgmr.msra.gmra.mrb[60].mxu0 %vm2696_vm5, %v8685_v32  ;;  %v7273_v42 = vpop.f32.mrb[82].mxu1 }
 0xf8e   : > { %v5040_v20 = vpop.f32.mrb[83].mxu1  ;;  %7238 = vmatprep.mubr.msk.bf16.mxu0 %vm4202_vm7, %v7656_v52  ;;  %v5075_v0 = vsel %vm4209_vm8, %v5057_v43, 0 }
 0xf8f   : > { %v5056_v45 = vpack.c.bf16 %v5040_v20, %v5037_v41 }
 0xf9b   : > { %v7292_v47 = vpop.f32.mrb[84].mxu1 }
 0xf9c   : > { %v5197_v48 = vpop.f32.mrb[85].mxu1  ;;  %v5217_v3 = vpack.c.bf16 %v7292_v47, %v7292_v47 }
 0xf9d   : > { %v7293_v49 = vpop.f32.mrb[86].mxu1 }
 0xf9e   : > { %v5200_v50 = vpop.f32.mrb[87].mxu1  ;;  %v5235_v5 = vsel %vm4209_vm8, %v5217_v3, 0 }
 0xf9f   : > { %v5216_v51 = vpack.c.bf16 %v5200_v50, %v5197_v48 }
0x1060   : > { %v7232_v53 = vpop.f32.mrb[60].mxu0 }
0x1061   : > { %v4717_v54 = vpop.f32.mrb[61].mxu0  ;;  %v4737_v57 = vpack.c.bf16 %v7232_v53, %v7232_v53 }
0x1062   : > { %v7233_v55 = vpop.f32.mrb[62].mxu0 }
0x1063   : > { %v4720_v26 = vpop.f32.mrb[63].mxu0  ;;  %v4755_v33 = vsel %vm4209_vm8, %v4737_v57, 0 }
0x1064   : > { %v4736_v56 = vpack.c.bf16 %v4720_v26, %v4717_v54 }
0x1066   : > { %7234 = vmatprep.subr.bf16.mxu0 %v4736_v56 }
0x1067   : > { %7235 = vmatpush3.bf16.msra.mxu0 %v4736_v56 }
0x1068   : > { %7388 = vmatprep.subr.msk.bf16.mxu0 %vm4209_vm8, %v4737_v57 }
0x106b   : > { %7237 = vmatpush3.bf16.msra.mxu0 %v4755_v33 }
0x106c   : > { %7254 = vmatprep.subr.bf16.mxu0 %v4896_v37 }
0x106e   : > { %7239 = vmatmul.mubr.msk.bf16.vlgmr.msra.gmra.mrb[56].mxu0 %vm4202_vm7, %v7657_v58 }
0x106f   : > { %7255 = vmatpush3.bf16.msra.mxu0 %v4896_v37  ;;  %7258 = vmatprep.mubr.msk.bf16.mxu0 %vm4202_vm7, %v7658_v59 }
0x1070   : > { %7389 = vmatprep.subr.msk.bf16.mxu0 %vm4209_vm8, %v4897_v60 }
0x1073   : > { %7257 = vmatpush3.bf16.msra.mxu0 %v4915_v61 }
0x1074   : > { %7274 = vmatprep.subr.bf16.mxu0 %v5056_v45 }
0x107a   : > { %7259 = vmatmul.mubr.msk.bf16.vlgmr.msra.gmra.mrb[56].mxu0 %vm4202_vm7, %v7659_v62 }
0x107b   : > { %7275 = vmatpush3.bf16.msra.mxu0 %v5056_v45  ;;  %7278 = vmatprep.mubr.msk.bf16.mxu0 %vm4202_vm7, %v7660_v63 }
0x107c   : > { %7390 = vmatprep.subr.msk.bf16.mxu0 %vm4209_vm8, %v5057_v43 }
0x107f   : > { %7277 = vmatpush3.bf16.msra.mxu0 %v5075_v0 }
0x1080   : > { %7294 = vmatprep.subr.bf16.mxu0 %v5216_v51 }
0x1086   : > { %7279 = vmatmul.mubr.msk.bf16.vlgmr.msra.gmra.mrb[56].mxu0 %vm4202_vm7, %v7661_v1 }
0x1087   : > { %7295 = vmatpush3.bf16.msra.mxu0 %v5216_v51  ;;  %7298 = vmatprep.mubr.msk.bf16.mxu0 %vm4202_vm7, %v7662_v2 }
0x1088   : > { %7391 = vmatprep.subr.msk.bf16.mxu0 %vm4209_vm8, %v5217_v3 }
0x108b   : > { %7297 = vmatpush3.bf16.msra.mxu0 %v5235_v5 }
0x108c   : > { %7302 = vmatprep.subr.bf16.mxu0 %v7663_v4 }
0x1092   : > { %7299 = vmatmul.mubr.msk.bf16.vlgmr.msra.gmra.mrb[56].mxu0 %vm4202_vm7, %v7664_v6 }
0x1093   : > { %7303 = vmatpush3.bf16.msra.mxu0 %v7663_v4  ;;  %7310 = vmatprep.mubr.msk.bf16.mxu0 %vm2696_vm5, %v8690_v36  ;;  %v7668_v36 = vld [vmem:[%s8916_s9 + $0x80] sm:$0xff]  }
0x1094   : > { %7304 = vmatprep.subr.bf16.mxu0 %v7665_v7 }
0x1097   : > { %7305 = vmatpush3.bf16.msra.mxu0 %v7665_v7 }
0x1098   : > { %7306 = vmatprep.subr.bf16.mxu0 %v7666_v8 }
0x109b   : > { %7307 = vmatpush3.bf16.msra.mxu0 %v7666_v8 }
0x109c   : > { %7308 = vmatprep.subr.bf16.mxu0 %v7667_v9 }
0x109f   : > { %7309 = vmatpush3.bf16.msra.mxu0 %v7667_v9 }
0x10a2   : > { %7311 = vmatmul.mubr.msk.bf16.vlgmr.msra.gmra.mrb[64].mxu0 %vm2696_vm5, %v8685_v32  ;;  %v7669_v32 = vld [vmem:[%s8916_s9 + $0x88] sm:$0xff]  }
0x10a3   : > { %7318 = vmatprep.mubr.msk.bf16.mxu0 %vm4202_vm7, %v7668_v36 }
0x1175   : > { %v7312_v10 = vpop.f32.mrb[64].mxu0 }
0x1176   : > { %v5357_v11 = vpop.f32.mrb[65].mxu0  ;;  %v5377_v15 = vpack.c.bf16 %v7312_v10, %v7312_v10 }
0x1177   : > { %v7313_v12 = vpop.f32.mrb[66].mxu0 }
0x1178   : > { %v5360_v13 = vpop.f32.mrb[67].mxu0  ;;  %v5395_v44 = vsel %vm4209_vm8, %v5377_v15, 0 }
0x1179   : > { %v5376_v14 = vpack.c.bf16 %v5360_v13, %v5357_v11 }
0x117b   : > { %7314 = vmatprep.subr.bf16.mxu0 %v5376_v14 }
0x117c   : > { %7315 = vmatpush3.bf16.msra.mxu0 %v5376_v14 }
0x117d   : > { %7392 = vmatprep.subr.msk.bf16.mxu0 %vm4209_vm8, %v5377_v15 }
0x1180   : > { %7317 = vmatpush3.bf16.msra.mxu0 %v5395_v44 }
0x1183   : > { %7319 = vmatmul.mubr.msk.bf16.vlgmr.msra.gmra.mrb[56].mxu0 %vm4202_vm7, %v7669_v32 }
0x1256   : > { %v7320_v19 = vpop.f32.mrb[56].mxu0 }
0x1257   : > { %v5476_v21 = vadd.f32 %v7320_v19, %v5467_v46  ;;  %v5431_v22 = vpop.f32.mrb[57].mxu0 }
0x1258   : > { %v5474_v24 = vadd.f32 %v5457_v17, %v5431_v22  ;;  %v7321_v25 = vpop.f32.mrb[58].mxu0 }
0x1259   : > { %v5480_v27 = vsub.f32 0.0, %v5476_v21  ;;  %v5477_v28 = vadd.f32 %v7321_v25, %v5472_v23  ;;  %v5434_v29 = vpop.f32.mrb[59].mxu0 }
0x125a   : > { %v5478_v30 = vsub.f32 0.0, %v5474_v24  ;;  %v5475_v31 = vadd.f32 %v5462_v18, %v5434_v29 }
0x125b   : > { %v5486_v16 = vmul.f32 1.442695, %v5480_v27  ;;  %v5481_v34 = vsub.f32 0.0, %v5477_v28 }
0x125c   : > { %v5482_v35 = vmul.f32 1.442695, %v5478_v30  ;;  %v5479_v37 = vsub.f32 0.0, %v5475_v31 }
0x125d   : > { %7690 = vpow2.f32 %v5486_v16  ;;  %v5488_v38 = vmul.f32 1.442695, %v5481_v34 }
0x125e   : > { %7692 = vpow2.f32 %v5482_v35  ;;  %v5484_v39 = vmul.f32 1.442695, %v5479_v37 }
0x125f   : > { %7694 = vpow2.f32 %v5488_v38 }
0x1260   : > { %7696 = vpow2.f32 %v5484_v39 }
0x1267   : > { %v7691_v40 = vpop.eup %7690 }
0x1268   : > { %v7693_v41 = vpop.eup %7692  ;;  %v5492_v42 = vadd.f32 1.0, %v7691_v40 }
0x1269   : > { %v7695_v20 = vpop.eup %7694  ;;  %v5490_v45 = vadd.f32 1.0, %v7693_v41 }
0x126a   : > { %v7697_v47 = vpop.eup %7696  ;;  %7698 = vrcp.f32 %v5492_v42  ;;  %v5493_v48 = vadd.f32 1.0, %v7695_v20 }
0x126b   : > { %7700 = vrcp.f32 %v5490_v45  ;;  %v5491_v49 = vadd.f32 1.0, %v7697_v47 }
0x126c   : > { %7702 = vrcp.f32 %v5493_v48 }
0x126d   : > { %7704 = vrcp.f32 %v5491_v49 }
0x1274   : > { %v7699_v50 = vpop.eup %7698 }
0x1275   : > { %v7701_v51 = vpop.eup %7700  ;;  %v5500_v52 = vmul.f32 %v7699_v50, %v5476_v21 }
0x1276   : > { %v7703_v53 = vpop.eup %7702  ;;  %v5498_v54 = vmul.f32 %v7701_v51, %v5474_v24 }
0x1277   : > { %v7705_v55 = vpop.eup %7704  ;;  %v6546_v26 = vpack.c.bf16 %v5500_v52, %v5500_v52  ;;  %v5501_v56 = vmul.f32 %v7703_v53, %v5477_v28 }
0x1278   : > { %v6544_v57 = vpack.c.bf16 %v5498_v54, %v5498_v54  ;;  %v5499_v33 = vmul.f32 %v7705_v55, %v5475_v31 }
0x1279   : > { %5521 = vst.msk [vmem:[%s543_s26 + $0x8] sm:$0xf] %vm5518_vm9, %v6546_v26  ;;  %v6547_v58 = vpack.c.bf16 %v5501_v56, %v5501_v56 }
0x127a   : > { %5519 = vst.msk [vmem:[%s543_s26] sm:$0xf] %vm5518_vm9, %v6544_v57  ;;  %v6545_v59 = vpack.c.bf16 %v5499_v33, %v5499_v33 }
0x127b   : > { %5522 = vst.msk [vmem:[%s543_s26 + $0xc] sm:$0xf] %vm5518_vm9, %v6547_v58 }
0x127c   : > { %5520 = vst.msk [vmem:[%s543_s26 + $0x4] sm:$0xf] %vm5518_vm9, %v6545_v59 }
0x127d PF: > { %s26_s18 = sadd.s32 1, %s7712_s18  }
0x127e   : > { %p23_p4 = scmp.ge.s32.totalorder %s26_s18, 4  }
0x1280   :  { %25 = sbr.rel (!%p23_p4) target bundleno = 1 (0x1), region = 190 }

</bundles_post_ra>
